<compile_context>
chip_gen: v7x
topology: tpu7x:2x2x1
jax: 0.10.0
libtpu: 0.0.40
codegen_flags: <defaults>
</compile_context>

<pallas_src>
import functools

import jax
import jax.numpy as jnp
import numpy as np
from jax.experimental import pallas as pl
from jax.experimental.pallas import tpu as pltpu

MATMUL_DTYPE = jnp.bfloat16          # bf16 MXU on v5e/v6e/v7x; f32 accumulate + f32 carries
VMEM_BUDGET_BYTES = 44 * 2**20       # target for blocks+scratch (fits v7x 64 MiB physical)


def _round_up(x, m):
    return ((x + m - 1) // m) * m


# --------------------------- VMEM accounting / tile selection ---------------------------
def _vmem_estimate(b_tile, t_chunk, d_in, h_pad, out_w, w_esize, fuse_out):
    G = 4 * h_pad
    b = 0
    b += 2 * t_chunk * b_tile * d_in * 4        # x blocks (double buffered)
    b += 2 * t_chunk * b_tile * out_w * 4       # y blocks (double buffered)
    b += t_chunk * b_tile * G * 4               # gx scratch (single)
    b += 2 * d_in * G * w_esize                 # W_ih^T (assume double buffered)
    b += h_pad * G * w_esize                    # W_hh^T scratch (single, manual DMA)
    b += 2 * b_tile * h_pad * 4                 # h, c carries
    if fuse_out:
        b += 2 * h_pad * out_w * w_esize + 2 * out_w * 4   # W_out^T + bias
    b += 2 * G * 4 + 2 * b_tile * 4             # gate bias + seq_len column
    return b


def _choose_tiles(B_pad0, T, d_in, h_pad, out_w, w_esize, fuse_out):
    t_chunk = 16 if h_pad <= 256 else 8                 # amortize per-grid-step overhead
    t_chunk = max(4, min(t_chunk, _round_up(T, 4)))
    b_tile = min(128, B_pad0)                           # cap live set / spills
    if B_pad0 >= 16:                                    # >=2 batch tiles -> v7x megacore
        b_tile = min(b_tile, max(8, _round_up(B_pad0 // 2, 8)))
    while _vmem_estimate(b_tile, t_chunk, d_in, h_pad, out_w, w_esize, fuse_out) > VMEM_BUDGET_BYTES:
        if b_tile > 64:
            b_tile = max(8, _round_up(b_tile // 2, 8))
        elif t_chunk > 4:
            t_chunk //= 2
        elif b_tile > 8:
            b_tile = max(8, _round_up(b_tile // 2, 8))
        else:
            break
    return b_tile, t_chunk


# --------------------------- fused LSTM layer kernel ---------------------------
def _lstm_layer_kernel(maxlen_ref, *refs, hidden_pad, t_chunk, matmul_dtype, fuse_out):
    if fuse_out:
        (x_ref, seq_ref, wih_ref, bias_ref, wout_ref, bout_ref, whh_hbm,
         y_ref, h_sc, c_sc, gx_sc, whh_vmem, dma_sem) = refs
    else:
        (x_ref, seq_ref, wih_ref, bias_ref, whh_hbm,
         y_ref, h_sc, c_sc, gx_sc, whh_vmem, dma_sem) = refs
        wout_ref = bout_ref = None

    H = hidden_pad
    bt = pl.program_id(0)          # batch tile (parallel)
    tc = pl.program_id(1)          # sequential time-chunk
    t0 = tc * t_chunk
    live = t0 < maxlen_ref[bt]     # does this chunk contain any valid timestep?

    @pl.when(jnp.logical_and(tc == 0, live))
    def _():
        h_sc[...] = jnp.zeros_like(h_sc)
        c_sc[...] = jnp.zeros_like(c_sc)
        # single-buffered resident W_hh^T: one DMA per batch tile, hidden behind the
        # chunk-0 input projection matmul below (wait is issued after that matmul).
        pltpu.make_async_copy(whh_hbm, whh_vmem, dma_sem.at[0]).start()

    @pl.when(live)
    def _():
        b_tile = x_ref.shape[1]
        d_in = x_ref.shape[2]
        # Fused input projection for the whole chunk: one big MXU matmul.
        xm = x_ref[...].reshape(t_chunk * b_tile, d_in).astype(matmul_dtype)
        gx = jnp.dot(xm, wih_ref[...], preferred_element_type=jnp.float32) + bias_ref[...]
        gx_sc[...] = gx.reshape(t_chunk, b_tile, 4 * H)

        @pl.when(tc == 0)
        def _():
            pltpu.make_async_copy(whh_hbm, whh_vmem, dma_sem.at[0]).wait()

        w_hh = whh_vmem[...]                 # (H_pad, 4*H_pad) resident
        seq = seq_ref[...]                   # (b_tile, 1) int32 resident
        if fuse_out:
            w_out = wout_ref[...]            # (H_pad, F_pad) resident
            b_out = bout_ref[...]            # (1, F_pad)

        def step(k, carry):
            h, c = carry
            gates = gx_sc[k] + jnp.dot(h.astype(matmul_dtype), w_hh,
                                       preferred_element_type=jnp.float32)
            i_g = jax.nn.sigmoid(gates[:, 0 * H:1 * H])
            f_g = jax.nn.sigmoid(gates[:, 1 * H:2 * H])
            g_g = jnp.tanh(gates[:, 2 * H:3 * H])
            o_g = jax.nn.sigmoid(gates[:, 3 * H:4 * H])
            c_new = f_g * c + i_g * g_g
            h_new = o_g * jnp.tanh(c_new)
            m = jnp.broadcast_to(seq > (t0 + k), h.shape)    # single hoisted broadcast
            c = jnp.where(m, c_new, c)                       # freeze c on padded steps
            h = jnp.where(m, h_new, h)                       # freeze h on padded steps
            h_out = jnp.where(m, h_new, 0.0)                 # packed semantics: 0 padding
            if fuse_out:
                # fused output Linear: padded steps get 0 @ W + b = bias (matches PyTorch)
                y_ref[k] = (jnp.dot(h_out.astype(matmul_dtype), w_out,
                                    preferred_element_type=jnp.float32)
                            + b_out).astype(y_ref.dtype)
            else:
                y_ref[k] = h_out.astype(y_ref.dtype)
            return (h, c)

        h, c = jax.lax.fori_loop(0, t_chunk, step, (h_sc[...], c_sc[...]), unroll=True)
        h_sc[...] = h
        c_sc[...] = c

    @pl.when(jnp.logical_not(live))
    def _():
        # Fully padded chunk: skip all compute / x streaming, just emit the padding value.
        if fuse_out:
            y_ref[...] = jnp.broadcast_to(bout_ref[...], y_ref.shape).astype(y_ref.dtype)
        else:
            y_ref[...] = jnp.zeros_like(y_ref)


def lstm_layer_pallas(x, seq_col, maxlen, wih_t, bias_row, whh_t,
                      wout_t=None, bout_row=None, *,
                      h_pad, t_chunk, b_tile, matmul_dtype, vmem_limit):
    """x: (T_pad, B_pad, D) f32; seq_col: (B_pad, 1) i32; maxlen: (n_btiles,) i32.
    wih_t: (D, 4*H_pad); whh_t: (H_pad, 4*H_pad); optional wout_t: (H_pad, F_pad)."""
    T_pad, B_pad, D = x.shape
    G = 4 * h_pad
    fuse_out = wout_t is not None
    out_w = wout_t.shape[1] if fuse_out else h_pad
    n_bt = B_pad // b_tile

    kernel = functools.partial(_lstm_layer_kernel, hidden_pad=h_pad, t_chunk=t_chunk,
                               matmul_dtype=matmul_dtype, fuse_out=fuse_out)

    # index_maps receive (bt, tc, maxlen_ref); dead chunks re-use block 0 (no extra HBM read)
    def x_map(bt, tc, ml):
        return (jnp.where(tc * t_chunk < ml[bt], tc, 0), bt, 0)

    in_specs = [
        pl.BlockSpec((t_chunk, b_tile, D), x_map),                       # x chunk (streamed)
        pl.BlockSpec((b_tile, 1), lambda bt, tc, ml: (bt, 0)),           # seq_len (resident)
        pl.BlockSpec((D, G), lambda bt, tc, ml: (0, 0)),                 # W_ih^T (resident)
        pl.BlockSpec((1, G), lambda bt, tc, ml: (0, 0)),                 # gate bias (resident)
    ]
    args = [x, seq_col, wih_t, bias_row]
    if fuse_out:
        in_specs += [pl.BlockSpec((h_pad, out_w), lambda bt, tc, ml: (0, 0)),
                     pl.BlockSpec((1, out_w), lambda bt, tc, ml: (0, 0))]
        args += [wout_t, bout_row]
    in_specs.append(pl.BlockSpec(memory_space=pl.ANY))                   # W_hh^T raw HBM
    args.append(whh_t)

    return pl.pallas_call(
        kernel,
        out_shape=jax.ShapeDtypeStruct((T_pad, B_pad, out_w), jnp.float32),
        grid_spec=pltpu.PrefetchScalarGridSpec(
            num_scalar_prefetch=1,
            grid=(n_bt, T_pad // t_chunk),
            in_specs=in_specs,
            out_specs=pl.BlockSpec((t_chunk, b_tile, out_w), lambda bt, tc, ml: (tc, bt, 0)),
            scratch_shapes=[
                pltpu.VMEM((b_tile, h_pad), jnp.float32),        # h carry
                pltpu.VMEM((b_tile, h_pad), jnp.float32),        # c carry
                pltpu.VMEM((t_chunk, b_tile, G), jnp.float32),   # per-chunk gates_x (never in HBM)
                pltpu.VMEM((h_pad, G), matmul_dtype),            # resident W_hh^T (single buffer)
                pltpu.SemaphoreType.DMA((1,)),
            ],
        ),
        compiler_params=pltpu.CompilerParams(
            dimension_semantics=("parallel", "arbitrary"),       # batch parallel, time sequential
            vmem_limit_bytes=vmem_limit),
    )(maxlen, *args)


# --------------------------- weight padding helpers (gate order i|f|g|o) ---------------------------
def _pad_gate_mat(w, H, H_pad, d_in_pad):
    """w: (4H, d_in) -> padded transpose (d_in_pad, 4*H_pad) with per-gate lane padding."""
    d_in = w.shape[1]
    w4 = w.reshape(4, H, d_in)
    w4 = jnp.pad(w4, ((0, 0), (0, H_pad - H), (0, d_in_pad - d_in)))
    return jnp.transpose(w4, (2, 0, 1)).reshape(d_in_pad, 4 * H_pad)


def _pad_gate_vec(b, H, H_pad):
    b4 = jnp.pad(b.reshape(4, H), ((0, 0), (0, H_pad - H)))
    return b4.reshape(1, 4 * H_pad).astype(jnp.float32)


# --------------------------- StandardLSTM (Pallas) ---------------------------
class StandardLSTMPallas:
    def __init__(self, input_dim, hidden_size, num_layers=1, bidirectional=False,
                 dropout=0.0, output_size=0, key=None, matmul_dtype=MATMUL_DTYPE):
        assert not bidirectional  # TODO(synk): bidirectional (reverse direction) not implemented
        assert dropout == 0.0     # TODO(synk): inter-layer dropout not implemented (eval no-op anyway)
        self.input_size = input_dim
        self.hidden_size = hidden_size
        self.num_layers = num_layers
        self.output_size = output_size if output_size > 0 else hidden_size
        self.matmul_dtype = matmul_dtype
        self.h_pad = _round_up(hidden_size, 128)
        self.f_pad = _round_up(self.output_size, 128)

        key = jax.random.PRNGKey(0) if key is None else key
        k = 1.0 / np.sqrt(hidden_size)
        self.layers = []      # raw PyTorch-layout weights (used by the reference)
        for layer in range(num_layers):
            d_in = input_dim if layer == 0 else hidden_size
            key, k1, k2, k3, k4 = jax.random.split(key, 5)
            w_ih = jax.random.uniform(k1, (4 * hidden_size, d_in), jnp.float32, -k, k)
            w_hh = jax.random.uniform(k2, (4 * hidden_size, hidden_size), jnp.float32, -k, k)
            b_ih = jax.random.uniform(k3, (4 * hidden_size,), jnp.float32, -k, k)
            b_hh = jax.random.uniform(k4, (4 * hidden_size,), jnp.float32, -k, k)
            self.layers.append((w_ih, w_hh, b_ih, b_hh))

        # Prepped (padded / transposed / cast) kernel weights, built once.
        self._prepped = []
        for li, (w_ih, w_hh, b_ih, b_hh) in enumerate(self.layers):
            d_in_pad = input_dim if li == 0 else self.h_pad
            wih_t = _pad_gate_mat(w_ih, hidden_size, self.h_pad, d_in_pad).astype(matmul_dtype)
            whh_t = _pad_gate_mat(w_hh, hidden_size, self.h_pad, self.h_pad).astype(matmul_dtype)
            bias = _pad_gate_vec(b_ih + b_hh, hidden_size, self.h_pad)
            self._prepped.append((wih_t, whh_t, bias))

        if output_size > 0:
            key, k1, k2 = jax.random.split(key, 3)
            ko = 1.0 / np.sqrt(hidden_size)
            self.out_w = jax.random.uniform(k1, (output_size, hidden_size), jnp.float32, -ko, ko)
            self.out_b = jax.random.uniform(k2, (output_size,), jnp.float32, -ko, ko)
            self._out_w_t = jnp.pad(self.out_w.T, ((0, self.h_pad - hidden_size),
                                                   (0, self.f_pad - output_size))).astype(matmul_dtype)
            self._out_b_row = jnp.pad(self.out_b, (0, self.f_pad - output_size)
                                      ).reshape(1, -1).astype(jnp.float32)
        else:
            self.out_w = None
            self.out_b = None

    def get_output_dim(self):
        return self.output_size

    def __call__(self, hidden, seq_len):
        """hidden: (B, T, input_dim); seq_len: (B,) int. Returns (B, T, output_size)."""
        B, T, _ = hidden.shape
        H, H_pad = self.hidden_size, self.h_pad
        fuse_out = self.out_w is not None
        out_w_last = self.f_pad if fuse_out else H_pad

        d_max = max([self.input_size] + ([H_pad] if self.num_layers > 1 else []))
        w_esize = 2 if self.matmul_dtype == jnp.bfloat16 else 4
        B_pad0 = _round_up(B, 8)
        b_tile, t_chunk = _choose_tiles(B_pad0, T, d_max, H_pad,
                                        max(out_w_last, H_pad), w_esize, fuse_out)
        est = _vmem_estimate(b_tile, t_chunk, d_max, H_pad,
                             max(out_w_last, H_pad), w_esize, fuse_out)
        vmem_limit = int(min(64 << 20, max(32 << 20, est + (8 << 20))))

        B_pad = _round_up(B_pad0, b_tile)
        T_pad = _round_up(T, t_chunk)

        x = jnp.transpose(hidden, (1, 0, 2)).astype(jnp.float32)            # (T, B, D)
        x = jnp.pad(x, ((0, T_pad - T), (0, B_pad - B), (0, 0)))
        seq_i = jnp.pad(seq_len.astype(jnp.int32), (0, B_pad - B))
        seq_col = seq_i[:, None]                                            # (B_pad, 1)
        maxlen = jnp.max(seq_i.reshape(B_pad // b_tile, b_tile), axis=1)    # per batch tile

        for li, (wih_t, whh_t, bias) in enumerate(self._prepped):
            last = li == self.num_layers - 1
            wout = self._out_w_t if (last and fuse_out) else None
            bout = self._out_b_row if (last and fuse_out) else None
            x = lstm_layer_pallas(x, seq_col, maxlen, wih_t, bias, whh_t, wout, bout,
                                  h_pad=H_pad, t_chunk=t_chunk, b_tile=b_tile,
                                  matmul_dtype=self.matmul_dtype, vmem_limit=vmem_limit)

        if fuse_out:
            y = x[:T, :B, :self.output_size]    # padded time steps hold the Linear bias (as PyTorch)
        else:
            y = x[:T, :B, :H]                   # padded time steps are zeros (pad_packed)
        return jnp.transpose(y, (1, 0, 2))


# --------------------------- pure-JAX reference for sanity ---------------------------
def _reference(hidden, seq_len, layers, out_w, out_b):
    B, T, _ = hidden.shape
    mask = (jnp.arange(T)[None, :] < seq_len[:, None]).astype(jnp.float32)
    x = hidden.astype(jnp.float32)
    for (w_ih, w_hh, b_ih, b_hh) in layers:
        H = w_hh.shape[1]

        def step(carry, inp):
            h, c = carry
            x_t, m_t = inp
            gates = x_t @ w_ih.T + h @ w_hh.T + b_ih + b_hh
            i = jax.nn.sigmoid(gates[:, :H]); f = jax.nn.sigmoid(gates[:, H:2 * H])
            g = jnp.tanh(gates[:, 2 * H:3 * H]); o = jax.nn.sigmoid(gates[:, 3 * H:])
            c_new = f * c + i * g
            h_new = o * jnp.tanh(c_new)
            c = m_t * c_new + (1 - m_t) * c
            h = m_t * h_new + (1 - m_t) * h
            return (h, c), m_t * h_new

        init = (jnp.zeros((B, H), jnp.float32), jnp.zeros((B, H), jnp.float32))
        xs = (jnp.swapaxes(x, 0, 1), jnp.swapaxes(mask[..., None], 0, 1))
        _, ys = jax.lax.scan(step, init, xs)
        x = jnp.swapaxes(ys, 0, 1)
    if out_w is not None:
        x = x @ out_w.T + out_b
    return x


if __name__ == "__main__":
    B, T, D, H = 2, 8, 16, 32
    key = jax.random.PRNGKey(0)
    hidden = jax.random.normal(key, (B, T, D), jnp.float32)
    seq_len = jnp.array([8, 5], dtype=jnp.int32)

    # Performance-default model: bf16 MXU matmuls, f32 accumulation / carries.
    model = StandardLSTMPallas(input_dim=D, hidden_size=H, num_layers=2,
                               bidirectional=False, dropout=0.0, output_size=24,
                               key=jax.random.PRNGKey(42))
    out = jax.block_until_ready(model(hidden, seq_len))

    ref = _reference(hidden, seq_len, model.layers, model.out_w, model.out_b)
    # bf16 matmul rounding compounds over T -> loose tolerance for the bf16-default model.
    np.testing.assert_allclose(np.asarray(out), np.asarray(ref), rtol=5e-2, atol=1e-1)

    # Same weights with f32 MXU matmuls: tight check of the kernel math.
    model_f32 = StandardLSTMPallas(input_dim=D, hidden_size=H, num_layers=2,
                                   bidirectional=False, dropout=0.0, output_size=24,
                                   key=jax.random.PRNGKey(42), matmul_dtype=jnp.float32)
    out_f32 = jax.block_until_ready(model_f32(hidden, seq_len))
    np.testing.assert_allclose(np.asarray(out_f32), np.asarray(ref), rtol=1e-4, atol=2e-4)

    print("KERNEL_OK")
</pallas_src>

<mosaic_0001>
module attributes {stable_mosaic.version = 11 : i64} {
  func.func @_lstm_layer_kernel(%arg0: i32, %arg1: i32, %arg2: memref<1xi32, #tpu.memory_space<smem>>, %arg3: memref<8x8x16xf32, #tpu.memory_space<vmem>>, %arg4: memref<8x1xi32, #tpu.memory_space<vmem>>, %arg5: memref<16x512xbf16, #tpu.memory_space<vmem>>, %arg6: memref<1x512xf32, #tpu.memory_space<vmem>>, %arg7: memref<128x512xbf16, #tpu.memory_space<any>>, %arg8: memref<8x8x128xf32, #tpu.memory_space<vmem>>, %arg9: memref<8x128xf32, #tpu.memory_space<vmem>>, %arg10: memref<8x128xf32, #tpu.memory_space<vmem>>, %arg11: memref<8x8x512xf32, #tpu.memory_space<vmem>>, %arg12: memref<128x512xbf16, #tpu.memory_space<vmem>>, %arg13: memref<1x!tpu.dma_semaphore, #tpu.memory_space<semaphore_mem>>) attributes {dimension_semantics = [#tpu.dimension_semantics<parallel>, #tpu.dimension_semantics<arbitrary>], iteration_bounds = array<i64: 1, 1>, scalar_prefetch = 1 : i64, scratch_operands = 5 : i64, tpu.core_type = #tpu.core_type<tc>, window_params = [{transform_indices = @transform_0, window_bounds = array<i64: 8, 8, 16>}, {transform_indices = @transform_1, window_bounds = array<i64: 8, 1>}, {pipeline_mode = #tpu.pipeline_mode<synchronous>, transform_indices = @transform_2, window_bounds = array<i64: 16, 512>}, {pipeline_mode = #tpu.pipeline_mode<synchronous>, transform_indices = @transform_3, window_bounds = array<i64: 1, 512>}, {}, {transform_indices = @transform_5, window_bounds = array<i64: 8, 8, 128>}]} {
    %c8_i32 = arith.constant 8 : i32
    %0 = arith.muli %arg1, %c8_i32 : i32
    %1 = arith.index_cast %arg0 : i32 to index
    %2 = memref.load %arg2[%1] : memref<1xi32, #tpu.memory_space<smem>>
    %3 = arith.cmpi slt, %0, %2 : i32
    %c0_i32 = arith.constant 0 : i32
    %4 = arith.cmpi eq, %arg1, %c0_i32 : i32
    %5 = arith.andi %4, %3 : i1
    %6 = arith.extui %5 : i1 to i32
    %c0_i32_0 = arith.constant 0 : i32
    %7 = arith.cmpi ne, %6, %c0_i32_0 : i32
    scf.if %7 {
      %cst = arith.constant 0.000000e+00 : f32
      %13 = vector.broadcast %cst : f32 to vector<8x128xf32>
      %c0 = arith.constant 0 : index
      %c0_3 = arith.constant 0 : index
      %14 = vector.load %arg9[%c0, %c0_3] : memref<8x128xf32, #tpu.memory_space<vmem>>, vector<8x128xf32>
      tpu.vector_store %arg9[%c0, %c0_3], %13 {strides = array<i32>} : memref<8x128xf32, #tpu.memory_space<vmem>>, vector<8x128xf32>,
      %cst_4 = arith.constant 0.000000e+00 : f32
      %15 = vector.broadcast %cst_4 : f32 to vector<8x128xf32>
      %c0_5 = arith.constant 0 : index
      %c0_6 = arith.constant 0 : index
      %16 = vector.load %arg10[%c0_5, %c0_6] : memref<8x128xf32, #tpu.memory_space<vmem>>, vector<8x128xf32>
      tpu.vector_store %arg10[%c0_5, %c0_6], %15 {strides = array<i32>} : memref<8x128xf32, #tpu.memory_space<vmem>>, vector<8x128xf32>,
      %c0_i32_7 = arith.constant 0 : i32
      %17 = tpu.memref_slice %arg13[%c0_i32_7] : memref<1x!tpu.dma_semaphore, #tpu.memory_space<semaphore_mem>> -> memref<1x!tpu.dma_semaphore, #tpu.memory_space<semaphore_mem>>
      %18 = tpu.memref_squeeze %17 : memref<1x!tpu.dma_semaphore, #tpu.memory_space<semaphore_mem>> -> memref<!tpu.dma_semaphore, #tpu.memory_space<semaphore_mem>>
      tpu.enqueue_dma source(%arg7 : memref<128x512xbf16, #tpu.memory_space<any>>) target(%arg12 : memref<128x512xbf16, #tpu.memory_space<vmem>>) target_semaphore(%18 : memref<!tpu.dma_semaphore, #tpu.memory_space<semaphore_mem>>)
    } else {
    }
    %8 = arith.extui %3 : i1 to i32
    %c0_i32_1 = arith.constant 0 : i32
    %9 = arith.cmpi ne, %8, %c0_i32_1 : i32
    scf.if %9 {
      %c0 = arith.constant 0 : index
      %c0_3 = arith.constant 0 : index
      %c0_4 = arith.constant 0 : index
      %13 = vector.load %arg3[%c0, %c0_3, %c0_4] : memref<8x8x16xf32, #tpu.memory_space<vmem>>, vector<8x8x16xf32>
      %14 = vector.shape_cast %13 : vector<8x8x16xf32> to vector<64x16xf32>
      %15 = arith.truncf %14 : vector<64x16xf32> to vector<64x16xbf16>
      %c0_5 = arith.constant 0 : index
      %c0_6 = arith.constant 0 : index
      %16 = vector.load %arg5[%c0_5, %c0_6] : memref<16x512xbf16, #tpu.memory_space<vmem>>, vector<16x512xbf16>
      %cst = arith.constant dense<0.000000e+00> : vector<64x512xf32>
      %17 = tpu.matmul %15, %16, %cst {dimension_numbers = #tpu.dot_dimension_numbers<[1], [0], [0], [1], [0, 0, 1, 1], [], []>} : vector<64x16xbf16>, vector<16x512xbf16>, vector<64x512xf32> -> vector<64x512xf32>
      %c0_7 = arith.constant 0 : index
      %c0_8 = arith.constant 0 : index
      %18 = vector.load %arg6[%c0_7, %c0_8] : memref<1x512xf32, #tpu.memory_space<vmem>>, vector<1x512xf32>
      %19 = vector.broadcast %18 : vector<1x512xf32> to vector<64x512xf32>
      %20 = arith.addf %17, %19 : vector<64x512xf32>
      %21 = vector.shape_cast %20 : vector<64x512xf32> to vector<8x8x512xf32>
      %c0_9 = arith.constant 0 : index
      %c0_10 = arith.constant 0 : index
      %c0_11 = arith.constant 0 : index
      %22 = vector.load %arg11[%c0_9, %c0_10, %c0_11] : memref<8x8x512xf32, #tpu.memory_space<vmem>>, vector<8x8x512xf32>
      tpu.vector_store %arg11[%c0_9, %c0_10, %c0_11], %21 {strides = array<i32>} : memref<8x8x512xf32, #tpu.memory_space<vmem>>, vector<8x8x512xf32>,
      %c0_i32_12 = arith.constant 0 : i32
      %23 = arith.cmpi eq, %arg1, %c0_i32_12 : i32
      %24 = arith.extui %23 : i1 to i32
      %c0_i32_13 = arith.constant 0 : i32
      %25 = arith.cmpi ne, %24, %c0_i32_13 : i32
      scf.if %25 {
        %c0_i32_100 = arith.constant 0 : i32
        %384 = tpu.memref_slice %arg13[%c0_i32_100] : memref<1x!tpu.dma_semaphore, #tpu.memory_space<semaphore_mem>> -> memref<1x!tpu.dma_semaphore, #tpu.memory_space<semaphore_mem>>
        %385 = tpu.memref_squeeze %384 : memref<1x!tpu.dma_semaphore, #tpu.memory_space<semaphore_mem>> -> memref<!tpu.dma_semaphore, #tpu.memory_space<semaphore_mem>>
        tpu.wait_dma2 semaphore(%385 : memref<!tpu.dma_semaphore, #tpu.memory_space<semaphore_mem>>) src(%arg7 : memref<128x512xbf16, #tpu.memory_space<any>>) dst(%arg12 : memref<128x512xbf16, #tpu.memory_space<vmem>>)
      } else {
      }
      %c0_14 = arith.constant 0 : index
      %c0_15 = arith.constant 0 : index
      %26 = vector.load %arg12[%c0_14, %c0_15] : memref<128x512xbf16, #tpu.memory_space<vmem>>, vector<128x512xbf16>
      %c0_16 = arith.constant 0 : index
      %c0_17 = arith.constant 0 : index
      %27 = vector.load %arg4[%c0_16, %c0_17] : memref<8x1xi32, #tpu.memory_space<vmem>>, vector<8x1xi32>
      %c0_18 = arith.constant 0 : index
      %c0_19 = arith.constant 0 : index
      %28 = vector.load %arg9[%c0_18, %c0_19] : memref<8x128xf32, #tpu.memory_space<vmem>>, vector<8x128xf32>
      %c0_20 = arith.constant 0 : index
      %c0_21 = arith.constant 0 : index
      %29 = vector.load %arg10[%c0_20, %c0_21] : memref<8x128xf32, #tpu.memory_space<vmem>>, vector<8x128xf32>
      %c0_i32_22 = arith.constant 0 : i32
      %30 = arith.index_cast %c0_i32_22 : i32 to index
      %c0_23 = arith.constant 0 : index
      %c0_24 = arith.constant 0 : index
      %31 = vector.load %arg11[%30, %c0_23, %c0_24] : memref<8x8x512xf32, #tpu.memory_space<vmem>>, vector<1x8x512xf32>
      %32 = vector.shape_cast %31 : vector<1x8x512xf32> to vector<8x512xf32>
      %33 = arith.truncf %28 : vector<8x128xf32> to vector<8x128xbf16>
      %cst_25 = arith.constant dense<0.000000e+00> : vector<8x512xf32>
      %34 = tpu.matmul %33, %26, %cst_25 {dimension_numbers = #tpu.dot_dimension_numbers<[1], [0], [0], [1], [0, 0, 1, 1], [], []>} : vector<8x128xbf16>, vector<128x512xbf16>, vector<8x512xf32> -> vector<8x512xf32>
      %35 = arith.addf %32, %34 : vector<8x512xf32>
      %36 = vector.extract_strided_slice %35 {offsets = [0, 0], sizes = [8, 128], strides = [1, 1]} : vector<8x512xf32> to vector<8x128xf32>
      %37 = arith.negf %36 : vector<8x128xf32>
      %38 = math.exp %37 : vector<8x128xf32>
      %cst_26 = arith.constant 1.000000e+00 : f32
      %39 = vector.broadcast %cst_26 : f32 to vector<8x128xf32>
      %40 = arith.addf %39, %38 : vector<8x128xf32>
      %41 = arith.divf %39, %40 : vector<8x128xf32>
      %42 = vector.extract_strided_slice %35 {offsets = [0, 128], sizes = [8, 128], strides = [1, 1]} : vector<8x512xf32> to vector<8x128xf32>
      %43 = arith.negf %42 : vector<8x128xf32>
      %44 = math.exp %43 : vector<8x128xf32>
      %cst_27 = arith.constant 1.000000e+00 : f32
      %45 = vector.broadcast %cst_27 : f32 to vector<8x128xf32>
      %46 = arith.addf %45, %44 : vector<8x128xf32>
      %47 = arith.divf %45, %46 : vector<8x128xf32>
      %48 = vector.extract_strided_slice %35 {offsets = [0, 256], sizes = [8, 128], strides = [1, 1]} : vector<8x512xf32> to vector<8x128xf32>
      %49 = math.tanh %48 : vector<8x128xf32>
      %50 = vector.extract_strided_slice %35 {offsets = [0, 384], sizes = [8, 128], strides = [1, 1]} : vector<8x512xf32> to vector<8x128xf32>
      %51 = arith.negf %50 : vector<8x128xf32>
      %52 = math.exp %51 : vector<8x128xf32>
      %cst_28 = arith.constant 1.000000e+00 : f32
      %53 = vector.broadcast %cst_28 : f32 to vector<8x128xf32>
      %54 = arith.addf %53, %52 : vector<8x128xf32>
      %55 = arith.divf %53, %54 : vector<8x128xf32>
      %56 = arith.mulf %47, %29 : vector<8x128xf32>
      %57 = arith.mulf %41, %49 : vector<8x128xf32>
      %58 = arith.addf %56, %57 : vector<8x128xf32>
      %59 = math.tanh %58 : vector<8x128xf32>
      %60 = arith.mulf %55, %59 : vector<8x128xf32>
      %61 = arith.addi %0, %c0_i32_22 : i32
      %62 = vector.broadcast %61 : i32 to vector<8x1xi32>
      %63 = arith.cmpi sgt, %27, %62 : vector<8x1xi32>
      %64 = vector.shape_cast %63 : vector<8x1xi1> to vector<8x1xi1>
      %65 = vector.broadcast %64 : vector<8x1xi1> to vector<8x128xi1>
      %66 = arith.select %65, %58, %29 : vector<8x128xi1>, vector<8x128xf32>
      %67 = arith.select %65, %60, %28 : vector<8x128xi1>, vector<8x128xf32>
      %cst_29 = arith.constant 0.000000e+00 : f32
      %68 = vector.broadcast %cst_29 : f32 to vector<8x128xf32>
      %69 = arith.select %65, %60, %68 : vector<8x128xi1>, vector<8x128xf32>
      %70 = arith.index_cast %c0_i32_22 : i32 to index
      %c0_30 = arith.constant 0 : index
      %c0_31 = arith.constant 0 : index
      %71 = vector.load %arg8[%70, %c0_30, %c0_31] : memref<8x8x128xf32, #tpu.memory_space<vmem>>, vector<1x8x128xf32>
      %72 = vector.shape_cast %71 : vector<1x8x128xf32> to vector<8x128xf32>
      %73 = vector.shape_cast %69 : vector<8x128xf32> to vector<1x8x128xf32>
      tpu.vector_store %arg8[%70, %c0_30, %c0_31], %73 {strides = array<i32>} : memref<8x8x128xf32, #tpu.memory_space<vmem>>, vector<1x8x128xf32>,
      %c1_i32 = arith.constant 1 : i32
      %74 = arith.index_cast %c1_i32 : i32 to index
      %c0_32 = arith.constant 0 : index
      %c0_33 = arith.constant 0 : index
      %75 = vector.load %arg11[%74, %c0_32, %c0_33] : memref<8x8x512xf32, #tpu.memory_space<vmem>>, vector<1x8x512xf32>
      %76 = vector.shape_cast %75 : vector<1x8x512xf32> to vector<8x512xf32>
      %77 = arith.truncf %67 : vector<8x128xf32> to vector<8x128xbf16>
      %cst_34 = arith.constant dense<0.000000e+00> : vector<8x512xf32>
      %78 = tpu.matmul %77, %26, %cst_34 {dimension_numbers = #tpu.dot_dimension_numbers<[1], [0], [0], [1], [0, 0, 1, 1], [], []>} : vector<8x128xbf16>, vector<128x512xbf16>, vector<8x512xf32> -> vector<8x512xf32>
      %79 = arith.addf %76, %78 : vector<8x512xf32>
      %80 = vector.extract_strided_slice %79 {offsets = [0, 0], sizes = [8, 128], strides = [1, 1]} : vector<8x512xf32> to vector<8x128xf32>
      %81 = arith.negf %80 : vector<8x128xf32>
      %82 = math.exp %81 : vector<8x128xf32>
      %cst_35 = arith.constant 1.000000e+00 : f32
      %83 = vector.broadcast %cst_35 : f32 to vector<8x128xf32>
      %84 = arith.addf %83, %82 : vector<8x128xf32>
      %85 = arith.divf %83, %84 : vector<8x128xf32>
      %86 = vector.extract_strided_slice %79 {offsets = [0, 128], sizes = [8, 128], strides = [1, 1]} : vector<8x512xf32> to vector<8x128xf32>
      %87 = arith.negf %86 : vector<8x128xf32>
      %88 = math.exp %87 : vector<8x128xf32>
      %cst_36 = arith.constant 1.000000e+00 : f32
      %89 = vector.broadcast %cst_36 : f32 to vector<8x128xf32>
      %90 = arith.addf %89, %88 : vector<8x128xf32>
      %91 = arith.divf %89, %90 : vector<8x128xf32>
      %92 = vector.extract_strided_slice %79 {offsets = [0, 256], sizes = [8, 128], strides = [1, 1]} : vector<8x512xf32> to vector<8x128xf32>
      %93 = math.tanh %92 : vector<8x128xf32>
      %94 = vector.extract_strided_slice %79 {offsets = [0, 384], sizes = [8, 128], strides = [1, 1]} : vector<8x512xf32> to vector<8x128xf32>
      %95 = arith.negf %94 : vector<8x128xf32>
      %96 = math.exp %95 : vector<8x128xf32>
      %cst_37 = arith.constant 1.000000e+00 : f32
      %97 = vector.broadcast %cst_37 : f32 to vector<8x128xf32>
      %98 = arith.addf %97, %96 : vector<8x128xf32>
      %99 = arith.divf %97, %98 : vector<8x128xf32>
      %100 = arith.mulf %91, %66 : vector<8x128xf32>
      %101 = arith.mulf %85, %93 : vector<8x128xf32>
      %102 = arith.addf %100, %101 : vector<8x128xf32>
      %103 = math.tanh %102 : vector<8x128xf32>
      %104 = arith.mulf %99, %103 : vector<8x128xf32>
      %105 = arith.addi %0, %c1_i32 : i32
      %106 = vector.broadcast %105 : i32 to vector<8x1xi32>
      %107 = arith.cmpi sgt, %27, %106 : vector<8x1xi32>
      %108 = vector.shape_cast %107 : vector<8x1xi1> to vector<8x1xi1>
      %109 = vector.broadcast %108 : vector<8x1xi1> to vector<8x128xi1>
      %110 = arith.select %109, %102, %66 : vector<8x128xi1>, vector<8x128xf32>
      %111 = arith.select %109, %104, %67 : vector<8x128xi1>, vector<8x128xf32>
      %cst_38 = arith.constant 0.000000e+00 : f32
      %112 = vector.broadcast %cst_38 : f32 to vector<8x128xf32>
      %113 = arith.select %109, %104, %112 : vector<8x128xi1>, vector<8x128xf32>
      %114 = arith.index_cast %c1_i32 : i32 to index
      %c0_39 = arith.constant 0 : index
      %c0_40 = arith.constant 0 : index
      %115 = vector.load %arg8[%114, %c0_39, %c0_40] : memref<8x8x128xf32, #tpu.memory_space<vmem>>, vector<1x8x128xf32>
      %116 = vector.shape_cast %115 : vector<1x8x128xf32> to vector<8x128xf32>
      %117 = vector.shape_cast %113 : vector<8x128xf32> to vector<1x8x128xf32>
      tpu.vector_store %arg8[%114, %c0_39, %c0_40], %117 {strides = array<i32>} : memref<8x8x128xf32, #tpu.memory_space<vmem>>, vector<1x8x128xf32>,
      %c2_i32 = arith.constant 2 : i32
      %118 = arith.index_cast %c2_i32 : i32 to index
      %c0_41 = arith.constant 0 : index
      %c0_42 = arith.constant 0 : index
      %119 = vector.load %arg11[%118, %c0_41, %c0_42] : memref<8x8x512xf32, #tpu.memory_space<vmem>>, vector<1x8x512xf32>
      %120 = vector.shape_cast %119 : vector<1x8x512xf32> to vector<8x512xf32>
      %121 = arith.truncf %111 : vector<8x128xf32> to vector<8x128xbf16>
      %cst_43 = arith.constant dense<0.000000e+00> : vector<8x512xf32>
      %122 = tpu.matmul %121, %26, %cst_43 {dimension_numbers = #tpu.dot_dimension_numbers<[1], [0], [0], [1], [0, 0, 1, 1], [], []>} : vector<8x128xbf16>, vector<128x512xbf16>, vector<8x512xf32> -> vector<8x512xf32>
      %123 = arith.addf %120, %122 : vector<8x512xf32>
      %124 = vector.extract_strided_slice %123 {offsets = [0, 0], sizes = [8, 128], strides = [1, 1]} : vector<8x512xf32> to vector<8x128xf32>
      %125 = arith.negf %124 : vector<8x128xf32>
      %126 = math.exp %125 : vector<8x128xf32>
      %cst_44 = arith.constant 1.000000e+00 : f32
      %127 = vector.broadcast %cst_44 : f32 to vector<8x128xf32>
      %128 = arith.addf %127, %126 : vector<8x128xf32>
      %129 = arith.divf %127, %128 : vector<8x128xf32>
      %130 = vector.extract_strided_slice %123 {offsets = [0, 128], sizes = [8, 128], strides = [1, 1]} : vector<8x512xf32> to vector<8x128xf32>
      %131 = arith.negf %130 : vector<8x128xf32>
      %132 = math.exp %131 : vector<8x128xf32>
      %cst_45 = arith.constant 1.000000e+00 : f32
      %133 = vector.broadcast %cst_45 : f32 to vector<8x128xf32>
      %134 = arith.addf %133, %132 : vector<8x128xf32>
      %135 = arith.divf %133, %134 : vector<8x128xf32>
      %136 = vector.extract_strided_slice %123 {offsets = [0, 256], sizes = [8, 128], strides = [1, 1]} : vector<8x512xf32> to vector<8x128xf32>
      %137 = math.tanh %136 : vector<8x128xf32>
      %138 = vector.extract_strided_slice %123 {offsets = [0, 384], sizes = [8, 128], strides = [1, 1]} : vector<8x512xf32> to vector<8x128xf32>
      %139 = arith.negf %138 : vector<8x128xf32>
      %140 = math.exp %139 : vector<8x128xf32>
      %cst_46 = arith.constant 1.000000e+00 : f32
      %141 = vector.broadcast %cst_46 : f32 to vector<8x128xf32>
      %142 = arith.addf %141, %140 : vector<8x128xf32>
      %143 = arith.divf %141, %142 : vector<8x128xf32>
      %144 = arith.mulf %135, %110 : vector<8x128xf32>
      %145 = arith.mulf %129, %137 : vector<8x128xf32>
      %146 = arith.addf %144, %145 : vector<8x128xf32>
      %147 = math.tanh %146 : vector<8x128xf32>
      %148 = arith.mulf %143, %147 : vector<8x128xf32>
      %149 = arith.addi %0, %c2_i32 : i32
      %150 = vector.broadcast %149 : i32 to vector<8x1xi32>
      %151 = arith.cmpi sgt, %27, %150 : vector<8x1xi32>
      %152 = vector.shape_cast %151 : vector<8x1xi1> to vector<8x1xi1>
      %153 = vector.broadcast %152 : vector<8x1xi1> to vector<8x128xi1>
      %154 = arith.select %153, %146, %110 : vector<8x128xi1>, vector<8x128xf32>
      %155 = arith.select %153, %148, %111 : vector<8x128xi1>, vector<8x128xf32>
      %cst_47 = arith.constant 0.000000e+00 : f32
      %156 = vector.broadcast %cst_47 : f32 to vector<8x128xf32>
      %157 = arith.select %153, %148, %156 : vector<8x128xi1>, vector<8x128xf32>
      %158 = arith.index_cast %c2_i32 : i32 to index
      %c0_48 = arith.constant 0 : index
      %c0_49 = arith.constant 0 : index
      %159 = vector.load %arg8[%158, %c0_48, %c0_49] : memref<8x8x128xf32, #tpu.memory_space<vmem>>, vector<1x8x128xf32>
      %160 = vector.shape_cast %159 : vector<1x8x128xf32> to vector<8x128xf32>
      %161 = vector.shape_cast %157 : vector<8x128xf32> to vector<1x8x128xf32>
      tpu.vector_store %arg8[%158, %c0_48, %c0_49], %161 {strides = array<i32>} : memref<8x8x128xf32, #tpu.memory_space<vmem>>, vector<1x8x128xf32>,
      %c3_i32 = arith.constant 3 : i32
      %162 = arith.index_cast %c3_i32 : i32 to index
      %c0_50 = arith.constant 0 : index
      %c0_51 = arith.constant 0 : index
      %163 = vector.load %arg11[%162, %c0_50, %c0_51] : memref<8x8x512xf32, #tpu.memory_space<vmem>>, vector<1x8x512xf32>
      %164 = vector.shape_cast %163 : vector<1x8x512xf32> to vector<8x512xf32>
      %165 = arith.truncf %155 : vector<8x128xf32> to vector<8x128xbf16>
      %cst_52 = arith.constant dense<0.000000e+00> : vector<8x512xf32>
      %166 = tpu.matmul %165, %26, %cst_52 {dimension_numbers = #tpu.dot_dimension_numbers<[1], [0], [0], [1], [0, 0, 1, 1], [], []>} : vector<8x128xbf16>, vector<128x512xbf16>, vector<8x512xf32> -> vector<8x512xf32>
      %167 = arith.addf %164, %166 : vector<8x512xf32>
      %168 = vector.extract_strided_slice %167 {offsets = [0, 0], sizes = [8, 128], strides = [1, 1]} : vector<8x512xf32> to vector<8x128xf32>
      %169 = arith.negf %168 : vector<8x128xf32>
      %170 = math.exp %169 : vector<8x128xf32>
      %cst_53 = arith.constant 1.000000e+00 : f32
      %171 = vector.broadcast %cst_53 : f32 to vector<8x128xf32>
      %172 = arith.addf %171, %170 : vector<8x128xf32>
      %173 = arith.divf %171, %172 : vector<8x128xf32>
      %174 = vector.extract_strided_slice %167 {offsets = [0, 128], sizes = [8, 128], strides = [1, 1]} : vector<8x512xf32> to vector<8x128xf32>
      %175 = arith.negf %174 : vector<8x128xf32>
      %176 = math.exp %175 : vector<8x128xf32>
      %cst_54 = arith.constant 1.000000e+00 : f32
      %177 = vector.broadcast %cst_54 : f32 to vector<8x128xf32>
      %178 = arith.addf %177, %176 : vector<8x128xf32>
      %179 = arith.divf %177, %178 : vector<8x128xf32>
      %180 = vector.extract_strided_slice %167 {offsets = [0, 256], sizes = [8, 128], strides = [1, 1]} : vector<8x512xf32> to vector<8x128xf32>
      %181 = math.tanh %180 : vector<8x128xf32>
      %182 = vector.extract_strided_slice %167 {offsets = [0, 384], sizes = [8, 128], strides = [1, 1]} : vector<8x512xf32> to vector<8x128xf32>
      %183 = arith.negf %182 : vector<8x128xf32>
      %184 = math.exp %183 : vector<8x128xf32>
      %cst_55 = arith.constant 1.000000e+00 : f32
      %185 = vector.broadcast %cst_55 : f32 to vector<8x128xf32>
      %186 = arith.addf %185, %184 : vector<8x128xf32>
      %187 = arith.divf %185, %186 : vector<8x128xf32>
      %188 = arith.mulf %179, %154 : vector<8x128xf32>
      %189 = arith.mulf %173, %181 : vector<8x128xf32>
      %190 = arith.addf %188, %189 : vector<8x128xf32>
      %191 = math.tanh %190 : vector<8x128xf32>
      %192 = arith.mulf %187, %191 : vector<8x128xf32>
      %193 = arith.addi %0, %c3_i32 : i32
      %194 = vector.broadcast %193 : i32 to vector<8x1xi32>
      %195 = arith.cmpi sgt, %27, %194 : vector<8x1xi32>
      %196 = vector.shape_cast %195 : vector<8x1xi1> to vector<8x1xi1>
      %197 = vector.broadcast %196 : vector<8x1xi1> to vector<8x128xi1>
      %198 = arith.select %197, %190, %154 : vector<8x128xi1>, vector<8x128xf32>
      %199 = arith.select %197, %192, %155 : vector<8x128xi1>, vector<8x128xf32>
      %cst_56 = arith.constant 0.000000e+00 : f32
      %200 = vector.broadcast %cst_56 : f32 to vector<8x128xf32>
      %201 = arith.select %197, %192, %200 : vector<8x128xi1>, vector<8x128xf32>
      %202 = arith.index_cast %c3_i32 : i32 to index
      %c0_57 = arith.constant 0 : index
      %c0_58 = arith.constant 0 : index
      %203 = vector.load %arg8[%202, %c0_57, %c0_58] : memref<8x8x128xf32, #tpu.memory_space<vmem>>, vector<1x8x128xf32>
      %204 = vector.shape_cast %203 : vector<1x8x128xf32> to vector<8x128xf32>
      %205 = vector.shape_cast %201 : vector<8x128xf32> to vector<1x8x128xf32>
      tpu.vector_store %arg8[%202, %c0_57, %c0_58], %205 {strides = array<i32>} : memref<8x8x128xf32, #tpu.memory_space<vmem>>, vector<1x8x128xf32>,
      %c4_i32 = arith.constant 4 : i32
      %206 = arith.index_cast %c4_i32 : i32 to index
      %c0_59 = arith.constant 0 : index
      %c0_60 = arith.constant 0 : index
      %207 = vector.load %arg11[%206, %c0_59, %c0_60] : memref<8x8x512xf32, #tpu.memory_space<vmem>>, vector<1x8x512xf32>
      %208 = vector.shape_cast %207 : vector<1x8x512xf32> to vector<8x512xf32>
      %209 = arith.truncf %199 : vector<8x128xf32> to vector<8x128xbf16>
      %cst_61 = arith.constant dense<0.000000e+00> : vector<8x512xf32>
      %210 = tpu.matmul %209, %26, %cst_61 {dimension_numbers = #tpu.dot_dimension_numbers<[1], [0], [0], [1], [0, 0, 1, 1], [], []>} : vector<8x128xbf16>, vector<128x512xbf16>, vector<8x512xf32> -> vector<8x512xf32>
      %211 = arith.addf %208, %210 : vector<8x512xf32>
      %212 = vector.extract_strided_slice %211 {offsets = [0, 0], sizes = [8, 128], strides = [1, 1]} : vector<8x512xf32> to vector<8x128xf32>
      %213 = arith.negf %212 : vector<8x128xf32>
      %214 = math.exp %213 : vector<8x128xf32>
      %cst_62 = arith.constant 1.000000e+00 : f32
      %215 = vector.broadcast %cst_62 : f32 to vector<8x128xf32>
      %216 = arith.addf %215, %214 : vector<8x128xf32>
      %217 = arith.divf %215, %216 : vector<8x128xf32>
      %218 = vector.extract_strided_slice %211 {offsets = [0, 128], sizes = [8, 128], strides = [1, 1]} : vector<8x512xf32> to vector<8x128xf32>
      %219 = arith.negf %218 : vector<8x128xf32>
      %220 = math.exp %219 : vector<8x128xf32>
      %cst_63 = arith.constant 1.000000e+00 : f32
      %221 = vector.broadcast %cst_63 : f32 to vector<8x128xf32>
      %222 = arith.addf %221, %220 : vector<8x128xf32>
      %223 = arith.divf %221, %222 : vector<8x128xf32>
      %224 = vector.extract_strided_slice %211 {offsets = [0, 256], sizes = [8, 128], strides = [1, 1]} : vector<8x512xf32> to vector<8x128xf32>
      %225 = math.tanh %224 : vector<8x128xf32>
      %226 = vector.extract_strided_slice %211 {offsets = [0, 384], sizes = [8, 128], strides = [1, 1]} : vector<8x512xf32> to vector<8x128xf32>
      %227 = arith.negf %226 : vector<8x128xf32>
      %228 = math.exp %227 : vector<8x128xf32>
      %cst_64 = arith.constant 1.000000e+00 : f32
      %229 = vector.broadcast %cst_64 : f32 to vector<8x128xf32>
      %230 = arith.addf %229, %228 : vector<8x128xf32>
      %231 = arith.divf %229, %230 : vector<8x128xf32>
      %232 = arith.mulf %223, %198 : vector<8x128xf32>
      %233 = arith.mulf %217, %225 : vector<8x128xf32>
      %234 = arith.addf %232, %233 : vector<8x128xf32>
      %235 = math.tanh %234 : vector<8x128xf32>
      %236 = arith.mulf %231, %235 : vector<8x128xf32>
      %237 = arith.addi %0, %c4_i32 : i32
      %238 = vector.broadcast %237 : i32 to vector<8x1xi32>
      %239 = arith.cmpi sgt, %27, %238 : vector<8x1xi32>
      %240 = vector.shape_cast %239 : vector<8x1xi1> to vector<8x1xi1>
      %241 = vector.broadcast %240 : vector<8x1xi1> to vector<8x128xi1>
      %242 = arith.select %241, %234, %198 : vector<8x128xi1>, vector<8x128xf32>
      %243 = arith.select %241, %236, %199 : vector<8x128xi1>, vector<8x128xf32>
      %cst_65 = arith.constant 0.000000e+00 : f32
      %244 = vector.broadcast %cst_65 : f32 to vector<8x128xf32>
      %245 = arith.select %241, %236, %244 : vector<8x128xi1>, vector<8x128xf32>
      %246 = arith.index_cast %c4_i32 : i32 to index
      %c0_66 = arith.constant 0 : index
      %c0_67 = arith.constant 0 : index
      %247 = vector.load %arg8[%246, %c0_66, %c0_67] : memref<8x8x128xf32, #tpu.memory_space<vmem>>, vector<1x8x128xf32>
      %248 = vector.shape_cast %247 : vector<1x8x128xf32> to vector<8x128xf32>
      %249 = vector.shape_cast %245 : vector<8x128xf32> to vector<1x8x128xf32>
      tpu.vector_store %arg8[%246, %c0_66, %c0_67], %249 {strides = array<i32>} : memref<8x8x128xf32, #tpu.memory_space<vmem>>, vector<1x8x128xf32>,
      %c5_i32 = arith.constant 5 : i32
      %250 = arith.index_cast %c5_i32 : i32 to index
      %c0_68 = arith.constant 0 : index
      %c0_69 = arith.constant 0 : index
      %251 = vector.load %arg11[%250, %c0_68, %c0_69] : memref<8x8x512xf32, #tpu.memory_space<vmem>>, vector<1x8x512xf32>
      %252 = vector.shape_cast %251 : vector<1x8x512xf32> to vector<8x512xf32>
      %253 = arith.truncf %243 : vector<8x128xf32> to vector<8x128xbf16>
      %cst_70 = arith.constant dense<0.000000e+00> : vector<8x512xf32>
      %254 = tpu.matmul %253, %26, %cst_70 {dimension_numbers = #tpu.dot_dimension_numbers<[1], [0], [0], [1], [0, 0, 1, 1], [], []>} : vector<8x128xbf16>, vector<128x512xbf16>, vector<8x512xf32> -> vector<8x512xf32>
      %255 = arith.addf %252, %254 : vector<8x512xf32>
      %256 = vector.extract_strided_slice %255 {offsets = [0, 0], sizes = [8, 128], strides = [1, 1]} : vector<8x512xf32> to vector<8x128xf32>
      %257 = arith.negf %256 : vector<8x128xf32>
      %258 = math.exp %257 : vector<8x128xf32>
      %cst_71 = arith.constant 1.000000e+00 : f32
      %259 = vector.broadcast %cst_71 : f32 to vector<8x128xf32>
      %260 = arith.addf %259, %258 : vector<8x128xf32>
      %261 = arith.divf %259, %260 : vector<8x128xf32>
      %262 = vector.extract_strided_slice %255 {offsets = [0, 128], sizes = [8, 128], strides = [1, 1]} : vector<8x512xf32> to vector<8x128xf32>
      %263 = arith.negf %262 : vector<8x128xf32>
      %264 = math.exp %263 : vector<8x128xf32>
      %cst_72 = arith.constant 1.000000e+00 : f32
      %265 = vector.broadcast %cst_72 : f32 to vector<8x128xf32>
      %266 = arith.addf %265, %264 : vector<8x128xf32>
      %267 = arith.divf %265, %266 : vector<8x128xf32>
      %268 = vector.extract_strided_slice %255 {offsets = [0, 256], sizes = [8, 128], strides = [1, 1]} : vector<8x512xf32> to vector<8x128xf32>
      %269 = math.tanh %268 : vector<8x128xf32>
      %270 = vector.extract_strided_slice %255 {offsets = [0, 384], sizes = [8, 128], strides = [1, 1]} : vector<8x512xf32> to vector<8x128xf32>
      %271 = arith.negf %270 : vector<8x128xf32>
      %272 = math.exp %271 : vector<8x128xf32>
      %cst_73 = arith.constant 1.000000e+00 : f32
      %273 = vector.broadcast %cst_73 : f32 to vector<8x128xf32>
      %274 = arith.addf %273, %272 : vector<8x128xf32>
      %275 = arith.divf %273, %274 : vector<8x128xf32>
      %276 = arith.mulf %267, %242 : vector<8x128xf32>
      %277 = arith.mulf %261, %269 : vector<8x128xf32>
      %278 = arith.addf %276, %277 : vector<8x128xf32>
      %279 = math.tanh %278 : vector<8x128xf32>
      %280 = arith.mulf %275, %279 : vector<8x128xf32>
      %281 = arith.addi %0, %c5_i32 : i32
      %282 = vector.broadcast %281 : i32 to vector<8x1xi32>
      %283 = arith.cmpi sgt, %27, %282 : vector<8x1xi32>
      %284 = vector.shape_cast %283 : vector<8x1xi1> to vector<8x1xi1>
      %285 = vector.broadcast %284 : vector<8x1xi1> to vector<8x128xi1>
      %286 = arith.select %285, %278, %242 : vector<8x128xi1>, vector<8x128xf32>
      %287 = arith.select %285, %280, %243 : vector<8x128xi1>, vector<8x128xf32>
      %cst_74 = arith.constant 0.000000e+00 : f32
      %288 = vector.broadcast %cst_74 : f32 to vector<8x128xf32>
      %289 = arith.select %285, %280, %288 : vector<8x128xi1>, vector<8x128xf32>
      %290 = arith.index_cast %c5_i32 : i32 to index
      %c0_75 = arith.constant 0 : index
      %c0_76 = arith.constant 0 : index
      %291 = vector.load %arg8[%290, %c0_75, %c0_76] : memref<8x8x128xf32, #tpu.memory_space<vmem>>, vector<1x8x128xf32>
      %292 = vector.shape_cast %291 : vector<1x8x128xf32> to vector<8x128xf32>
      %293 = vector.shape_cast %289 : vector<8x128xf32> to vector<1x8x128xf32>
      tpu.vector_store %arg8[%290, %c0_75, %c0_76], %293 {strides = array<i32>} : memref<8x8x128xf32, #tpu.memory_space<vmem>>, vector<1x8x128xf32>,
      %c6_i32 = arith.constant 6 : i32
      %294 = arith.index_cast %c6_i32 : i32 to index
      %c0_77 = arith.constant 0 : index
      %c0_78 = arith.constant 0 : index
      %295 = vector.load %arg11[%294, %c0_77, %c0_78] : memref<8x8x512xf32, #tpu.memory_space<vmem>>, vector<1x8x512xf32>
      %296 = vector.shape_cast %295 : vector<1x8x512xf32> to vector<8x512xf32>
      %297 = arith.truncf %287 : vector<8x128xf32> to vector<8x128xbf16>
      %cst_79 = arith.constant dense<0.000000e+00> : vector<8x512xf32>
      %298 = tpu.matmul %297, %26, %cst_79 {dimension_numbers = #tpu.dot_dimension_numbers<[1], [0], [0], [1], [0, 0, 1, 1], [], []>} : vector<8x128xbf16>, vector<128x512xbf16>, vector<8x512xf32> -> vector<8x512xf32>
      %299 = arith.addf %296, %298 : vector<8x512xf32>
      %300 = vector.extract_strided_slice %299 {offsets = [0, 0], sizes = [8, 128], strides = [1, 1]} : vector<8x512xf32> to vector<8x128xf32>
      %301 = arith.negf %300 : vector<8x128xf32>
      %302 = math.exp %301 : vector<8x128xf32>
      %cst_80 = arith.constant 1.000000e+00 : f32
      %303 = vector.broadcast %cst_80 : f32 to vector<8x128xf32>
      %304 = arith.addf %303, %302 : vector<8x128xf32>
      %305 = arith.divf %303, %304 : vector<8x128xf32>
      %306 = vector.extract_strided_slice %299 {offsets = [0, 128], sizes = [8, 128], strides = [1, 1]} : vector<8x512xf32> to vector<8x128xf32>
      %307 = arith.negf %306 : vector<8x128xf32>
      %308 = math.exp %307 : vector<8x128xf32>
      %cst_81 = arith.constant 1.000000e+00 : f32
      %309 = vector.broadcast %cst_81 : f32 to vector<8x128xf32>
      %310 = arith.addf %309, %308 : vector<8x128xf32>
      %311 = arith.divf %309, %310 : vector<8x128xf32>
      %312 = vector.extract_strided_slice %299 {offsets = [0, 256], sizes = [8, 128], strides = [1, 1]} : vector<8x512xf32> to vector<8x128xf32>
      %313 = math.tanh %312 : vector<8x128xf32>
      %314 = vector.extract_strided_slice %299 {offsets = [0, 384], sizes = [8, 128], strides = [1, 1]} : vector<8x512xf32> to vector<8x128xf32>
      %315 = arith.negf %314 : vector<8x128xf32>
      %316 = math.exp %315 : vector<8x128xf32>
      %cst_82 = arith.constant 1.000000e+00 : f32
      %317 = vector.broadcast %cst_82 : f32 to vector<8x128xf32>
      %318 = arith.addf %317, %316 : vector<8x128xf32>
      %319 = arith.divf %317, %318 : vector<8x128xf32>
      %320 = arith.mulf %311, %286 : vector<8x128xf32>
      %321 = arith.mulf %305, %313 : vector<8x128xf32>
      %322 = arith.addf %320, %321 : vector<8x128xf32>
      %323 = math.tanh %322 : vector<8x128xf32>
      %324 = arith.mulf %319, %323 : vector<8x128xf32>
      %325 = arith.addi %0, %c6_i32 : i32
      %326 = vector.broadcast %325 : i32 to vector<8x1xi32>
      %327 = arith.cmpi sgt, %27, %326 : vector<8x1xi32>
      %328 = vector.shape_cast %327 : vector<8x1xi1> to vector<8x1xi1>
      %329 = vector.broadcast %328 : vector<8x1xi1> to vector<8x128xi1>
      %330 = arith.select %329, %322, %286 : vector<8x128xi1>, vector<8x128xf32>
      %331 = arith.select %329, %324, %287 : vector<8x128xi1>, vector<8x128xf32>
      %cst_83 = arith.constant 0.000000e+00 : f32
      %332 = vector.broadcast %cst_83 : f32 to vector<8x128xf32>
      %333 = arith.select %329, %324, %332 : vector<8x128xi1>, vector<8x128xf32>
      %334 = arith.index_cast %c6_i32 : i32 to index
      %c0_84 = arith.constant 0 : index
      %c0_85 = arith.constant 0 : index
      %335 = vector.load %arg8[%334, %c0_84, %c0_85] : memref<8x8x128xf32, #tpu.memory_space<vmem>>, vector<1x8x128xf32>
      %336 = vector.shape_cast %335 : vector<1x8x128xf32> to vector<8x128xf32>
      %337 = vector.shape_cast %333 : vector<8x128xf32> to vector<1x8x128xf32>
      tpu.vector_store %arg8[%334, %c0_84, %c0_85], %337 {strides = array<i32>} : memref<8x8x128xf32, #tpu.memory_space<vmem>>, vector<1x8x128xf32>,
      %c7_i32 = arith.constant 7 : i32
      %338 = arith.index_cast %c7_i32 : i32 to index
      %c0_86 = arith.constant 0 : index
      %c0_87 = arith.constant 0 : index
      %339 = vector.load %arg11[%338, %c0_86, %c0_87] : memref<8x8x512xf32, #tpu.memory_space<vmem>>, vector<1x8x512xf32>
      %340 = vector.shape_cast %339 : vector<1x8x512xf32> to vector<8x512xf32>
      %341 = arith.truncf %331 : vector<8x128xf32> to vector<8x128xbf16>
      %cst_88 = arith.constant dense<0.000000e+00> : vector<8x512xf32>
      %342 = tpu.matmul %341, %26, %cst_88 {dimension_numbers = #tpu.dot_dimension_numbers<[1], [0], [0], [1], [0, 0, 1, 1], [], []>} : vector<8x128xbf16>, vector<128x512xbf16>, vector<8x512xf32> -> vector<8x512xf32>
      %343 = arith.addf %340, %342 : vector<8x512xf32>
      %344 = vector.extract_strided_slice %343 {offsets = [0, 0], sizes = [8, 128], strides = [1, 1]} : vector<8x512xf32> to vector<8x128xf32>
      %345 = arith.negf %344 : vector<8x128xf32>
      %346 = math.exp %345 : vector<8x128xf32>
      %cst_89 = arith.constant 1.000000e+00 : f32
      %347 = vector.broadcast %cst_89 : f32 to vector<8x128xf32>
      %348 = arith.addf %347, %346 : vector<8x128xf32>
      %349 = arith.divf %347, %348 : vector<8x128xf32>
      %350 = vector.extract_strided_slice %343 {offsets = [0, 128], sizes = [8, 128], strides = [1, 1]} : vector<8x512xf32> to vector<8x128xf32>
      %351 = arith.negf %350 : vector<8x128xf32>
      %352 = math.exp %351 : vector<8x128xf32>
      %cst_90 = arith.constant 1.000000e+00 : f32
      %353 = vector.broadcast %cst_90 : f32 to vector<8x128xf32>
      %354 = arith.addf %353, %352 : vector<8x128xf32>
      %355 = arith.divf %353, %354 : vector<8x128xf32>
      %356 = vector.extract_strided_slice %343 {offsets = [0, 256], sizes = [8, 128], strides = [1, 1]} : vector<8x512xf32> to vector<8x128xf32>
      %357 = math.tanh %356 : vector<8x128xf32>
      %358 = vector.extract_strided_slice %343 {offsets = [0, 384], sizes = [8, 128], strides = [1, 1]} : vector<8x512xf32> to vector<8x128xf32>
      %359 = arith.negf %358 : vector<8x128xf32>
      %360 = math.exp %359 : vector<8x128xf32>
      %cst_91 = arith.constant 1.000000e+00 : f32
      %361 = vector.broadcast %cst_91 : f32 to vector<8x128xf32>
      %362 = arith.addf %361, %360 : vector<8x128xf32>
      %363 = arith.divf %361, %362 : vector<8x128xf32>
      %364 = arith.mulf %355, %330 : vector<8x128xf32>
      %365 = arith.mulf %349, %357 : vector<8x128xf32>
      %366 = arith.addf %364, %365 : vector<8x128xf32>
      %367 = math.tanh %366 : vector<8x128xf32>
      %368 = arith.mulf %363, %367 : vector<8x128xf32>
      %369 = arith.addi %0, %c7_i32 : i32
      %370 = vector.broadcast %369 : i32 to vector<8x1xi32>
      %371 = arith.cmpi sgt, %27, %370 : vector<8x1xi32>
      %372 = vector.shape_cast %371 : vector<8x1xi1> to vector<8x1xi1>
      %373 = vector.broadcast %372 : vector<8x1xi1> to vector<8x128xi1>
      %374 = arith.select %373, %366, %330 : vector<8x128xi1>, vector<8x128xf32>
      %375 = arith.select %373, %368, %331 : vector<8x128xi1>, vector<8x128xf32>
      %cst_92 = arith.constant 0.000000e+00 : f32
      %376 = vector.broadcast %cst_92 : f32 to vector<8x128xf32>
      %377 = arith.select %373, %368, %376 : vector<8x128xi1>, vector<8x128xf32>
      %378 = arith.index_cast %c7_i32 : i32 to index
      %c0_93 = arith.constant 0 : index
      %c0_94 = arith.constant 0 : index
      %379 = vector.load %arg8[%378, %c0_93, %c0_94] : memref<8x8x128xf32, #tpu.memory_space<vmem>>, vector<1x8x128xf32>
      %380 = vector.shape_cast %379 : vector<1x8x128xf32> to vector<8x128xf32>
      %381 = vector.shape_cast %377 : vector<8x128xf32> to vector<1x8x128xf32>
      tpu.vector_store %arg8[%378, %c0_93, %c0_94], %381 {strides = array<i32>} : memref<8x8x128xf32, #tpu.memory_space<vmem>>, vector<1x8x128xf32>,
      %c8_i32_95 = arith.constant 8 : i32
      %c0_96 = arith.constant 0 : index
      %c0_97 = arith.constant 0 : index
      %382 = vector.load %arg9[%c0_96, %c0_97] : memref<8x128xf32, #tpu.memory_space<vmem>>, vector<8x128xf32>
      tpu.vector_store %arg9[%c0_96, %c0_97], %375 {strides = array<i32>} : memref<8x128xf32, #tpu.memory_space<vmem>>, vector<8x128xf32>,
      %c0_98 = arith.constant 0 : index
      %c0_99 = arith.constant 0 : index
      %383 = vector.load %arg10[%c0_98, %c0_99] : memref<8x128xf32, #tpu.memory_space<vmem>>, vector<8x128xf32>
      tpu.vector_store %arg10[%c0_98, %c0_99], %374 {strides = array<i32>} : memref<8x128xf32, #tpu.memory_space<vmem>>, vector<8x128xf32>,
    } else {
    }
    %true = arith.constant true
    %10 = arith.xori %3, %true : i1
    %11 = arith.extui %10 : i1 to i32
    %c0_i32_2 = arith.constant 0 : i32
    %12 = arith.cmpi ne, %11, %c0_i32_2 : i32
    scf.if %12 {
      %cst = arith.constant 0.000000e+00 : f32
      %13 = vector.broadcast %cst : f32 to vector<8x8x128xf32>
      %c0 = arith.constant 0 : index
      %c0_3 = arith.constant 0 : index
      %c0_4 = arith.constant 0 : index
      %14 = vector.load %arg8[%c0, %c0_3, %c0_4] : memref<8x8x128xf32, #tpu.memory_space<vmem>>, vector<8x8x128xf32>
      tpu.vector_store %arg8[%c0, %c0_3, %c0_4], %13 {strides = array<i32>} : memref<8x8x128xf32, #tpu.memory_space<vmem>>, vector<8x8x128xf32>,
    } else {
    }
    return
  }
  func.func @transform_0(%arg0: i32, %arg1: i32, %arg2: memref<1xi32, #tpu.memory_space<smem>>) -> (i32, i32, i32) {
    %c8_i32 = arith.constant 8 : i32
    %0 = arith.muli %arg1, %c8_i32 : i32
    %1 = arith.index_cast %arg0 : i32 to index
    %2 = memref.load %arg2[%1] : memref<1xi32, #tpu.memory_space<smem>>
    %3 = arith.cmpi slt, %0, %2 : i32
    %c0_i32 = arith.constant 0 : i32
    %4 = arith.select %3, %arg1, %c0_i32 : i32
    %c0_i32_0 = arith.constant 0 : i32
    %c0_i32_1 = arith.constant 0 : i32
    return %4, %arg0, %c0_i32_0 : i32, i32, i32
  }
  func.func @transform_1(%arg0: i32, %arg1: i32, %arg2: memref<1xi32, #tpu.memory_space<smem>>) -> (i32, i32) {
    %c0_i32 = arith.constant 0 : i32
    %c0_i32_0 = arith.constant 0 : i32
    return %arg0, %c0_i32 : i32, i32
  }
  func.func @transform_2(%arg0: i32, %arg1: i32, %arg2: memref<1xi32, #tpu.memory_space<smem>>) -> (i32, i32) {
    %c0_i32 = arith.constant 0 : i32
    %c0_i32_0 = arith.constant 0 : i32
    %c0_i32_1 = arith.constant 0 : i32
    return %c0_i32, %c0_i32_0 : i32, i32
  }
  func.func @transform_3(%arg0: i32, %arg1: i32, %arg2: memref<1xi32, #tpu.memory_space<smem>>) -> (i32, i32) {
    %c0_i32 = arith.constant 0 : i32
    %c0_i32_0 = arith.constant 0 : i32
    %c0_i32_1 = arith.constant 0 : i32
    return %c0_i32, %c0_i32_0 : i32, i32
  }
  func.func @transform_5(%arg0: i32, %arg1: i32, %arg2: memref<1xi32, #tpu.memory_space<smem>>) -> (i32, i32, i32) {
    %c0_i32 = arith.constant 0 : i32
    %c0_i32_0 = arith.constant 0 : i32
    return %arg1, %arg0, %c0_i32 : i32, i32, i32
  }
}

</mosaic_0001>

<bundles_post_ra>
// kernel: tpu_custom_call.1
= control target key start
LH: loop header
LB: loop body
LE: loop exit
PB: predicated region body
PF: predicated region fallthrough
CT: control target
= control target key end

     0   :  { %12 = vsyncpa [#allocation10], 0  ;;  %s2411_s0 = inlined_call_operand.<no memory space> [shape: s32[1], index: 0, kind: input, shape index: {}]   ;;  %s2412_s1 = inlined_call_operand.hbm [shape: f32[8,8,16], index: 1, kind: input, shape index: {}]   ;;  %s2413_s2 = inlined_call_operand.vmem [shape: s32[8,1], index: 2, kind: input, shape index: {}]   ;;  %s2414_s3 = inlined_call_operand.hbm [shape: bf16[16,512], index: 3, kind: input, shape index: {}]   ;;  %s2415_s4 = inlined_call_operand.vmem [shape: f32[1,512], index: 4, kind: input, shape index: {}]   ;;  %s2416_s5 = inlined_call_operand.hbm [shape: bf16[128,512], index: 5, kind: input, shape index: {}]   ;;  %s2417_s6 = inlined_call_operand.hbm [shape: f32[8,8,128], index: 6, kind: output, shape index: {}]  }
   0x1   :  { %13 = vsyncpa [#allocation13], 0 }
   0x2   :  { %14 = vsyncpa [#allocation11], 0  ;;  %s1777_s21 = smov [#allocation9]   ;;  %s1703_s25 = scalar_lea.hbm %s2412_s1, 1024 }
   0x3   :  { %s27_s22 = sshll.u32 %s1777_s21, 4  ;;  %p1704_p0 = scmp.ne.s32.totalorder %s2412_s1, %s1703_s25  ;;  %s28_s22 = int_to_ptr.vmem [resolvable:$true] %s27_s22 }
   0x4   :  { %p1707_p1 = scmp.lt.u32.totalorder %s1703_s25, %s2412_s1 }
   0x6   :  { %p1709_p2 = pnand %p1707_p1, %p1704_p0 }
   0x8   :  { %1712 = shalt.err (!%p1709_p2)
}
   0x9   :  { %s1713_s30 = scalar_lea.vmem %s28_s22, 1024  ;;  %p1718_p4 = scmp.lt.s32.totalorder %s28_s22, %s28_s22 }
   0xa   :  { %p1714_p3 = scmp.ne.s32.totalorder %s28_s22, %s1713_s30  ;;  %p1719_p5 = scmp.lt.s32.totalorder %s1713_s30, %s1713_s30 }
   0xc   :  { %p1720_p6 = por %p1719_p5, %p1718_p4 }
   0xe   :  { %p1721_p7 = pnand %p1720_p6, %p1714_p3 }
  0x10   :  { %1724 = shalt.err (!%p1721_p7)
}
  0x11   :  { %s1778_s7 = smov 128   ;;  %s1779_s8 = smov 8  }
  0x12   :  { %33 = dma.hbm_to_vmem [thread:$0]  %s2412_s1, 1024, %s28_s22, [#allocation10], %s1778_s7, %s1778_s7, %s1779_s8  }
  0x13   :  { %s1780_s11 = smov [#allocation12]   ;;  %s1725_s15 = scalar_lea.hbm %s2414_s3, 512 }
  0x14   :  { %s41_s12 = sshll.u32 %s1780_s11, 4  ;;  %p1726_p8 = scmp.ne.s32.totalorder %s2414_s3, %s1725_s15  ;;  %s42_s12 = int_to_ptr.vmem [resolvable:$true] %s41_s12 }
  0x15   :  { %p1729_p9 = scmp.lt.u32.totalorder %s1725_s15, %s2414_s3 }
  0x17   :  { %p1731_p10 = pnand %p1729_p9, %p1726_p8 }
  0x19   :  { %1734 = shalt.err (!%p1731_p10)
}
  0x1a   :  { %s1735_s20 = scalar_lea.vmem %s42_s12, 512  ;;  %p1740_p12 = scmp.lt.s32.totalorder %s42_s12, %s42_s12 }
  0x1b   :  { %p1736_p11 = scmp.ne.s32.totalorder %s42_s12, %s1735_s20  ;;  %p1741_p13 = scmp.lt.s32.totalorder %s1735_s20, %s1735_s20 }
  0x1d   :  { %p1742_p0 = por %p1741_p13, %p1740_p12 }
  0x1f   :  { %p1743_p1 = pnand %p1742_p0, %p1736_p11 }
  0x21   :  { %1746 = shalt.err (!%p1743_p1)
}
  0x22   :  { %s1781_s1 = smov 256   ;;  %s1782_s21 = smov 16  }
  0x23   :  { %47 = dma.hbm_to_vmem [thread:$0]  %s2414_s3, 512, %s42_s12, [#allocation13], %s1781_s1, %s1781_s1, %s1782_s21  }
  0x24   :  { %1769 = dma.done.wait [#allocation10], 1024  }
  0x25   :  { %1770 = vsyncadd [#allocation10], 4294966272 }
  0x26   :  { %1771 = dma.done.wait [#allocation13], 512  }
  0x27   :  { %1772 = vsyncadd [#allocation13], 4294966784  ;;  %p1471_p2 = scmp.gt.s32.totalorder %s2411_s0, 0 }
  0x29   :  { %69 = sbr.rel (!%p1471_p2) target bundleno = 60 (0x3c), region = 29 }
  0x30   :  { %s76_s28 = sld [smem:[#allocation0]]   ;;  %v1783_v0 = vmov 0.0   ;;  %s1784_s29 = smov [#allocation5]  }
  0x31   :  { %70 = vst [vmem:[#allocation2] sm:$0xff] %v1783_v0  ;;  %71 = vst [vmem:[#allocation3] sm:$0xff] %v1783_v0  ;;  %s84_s30 = sshll.u32 %s1784_s29, 4  ;;  %s1785_s3 = smov 512   ;;  %s85_s30 = int_to_ptr.vmem [resolvable:$true] %s84_s30 }
  0x32   :  { %88 = sst [smem:[#allocation16]] %s1785_s3  ;;  %s1786_s9 = smov 4  }
  0x33   :  { %90 = sst [smem:[#allocation16 + $0x1]] %s1785_s3  ;;  %s1787_s10 = smov 64  }
  0x34   :  { %92 = sst [smem:[#allocation16 + $0x2]] %s1786_s9  ;;  %s1788_s12 = smov 128  }
  0x35   :  { %94 = sst [smem:[#allocation16 + $0x3]] %s1787_s10  ;;  %s1789_s14 = smov 2  }
  0x36   :  { %s1473_s11 = sshll.u32 %s76_s28, 26  ;;  %96 = sst [smem:[#allocation16 + $0x4]] %s1788_s12 }
  0x37   :  { %s1474_s13 = sadd.s32 134217728, %s1473_s11  ;;  %98 = sst [smem:[#allocation16 + $0x5]] %s1789_s14 }
  0x38   :  { %s1790_s15 = smov 256   ;;  %102 = sst [smem:[#allocation16 + $0x7]] %s1787_s10 }
  0x39   :  { %100 = sst [smem:[#allocation16 + $0x6]] %s1790_s15  ;;  %s1791_s16 = smov [#allocation6]  }
  0x3a   :  { %104 = sst [smem:[#allocation16 + $0x8]] %s1786_s9  ;;  %s1792_s17 = smov [#allocation15]  }
  0x3b   :  { %106 = dma.general %s2416_s5, 4096, %s85_s30, %s1791_s16, %s1792_s17, [#allocation16], %s1474_s13, 0  }
  0x3c PF:  { %p1475_p3 = scmp.le.s32.totalorder %s2411_s0, 0 }
  0x3e   :  { %109 = sbr.rel (%p1475_p3) target bundleno = 2439 (0x987), region = 33 }
  0x45   :  { %v1535_v1 = vld [vmem:[#allocation12 + $0x4] ss:$16 sps:$4 sm:$0xff]   ;;  %v1537_v2 = vld [vmem:[#allocation12 + $0xc] ss:$16 sps:$4 sm:$0xff]   ;;  %v2418_v3 = vmov 0   ;;  %vm168_vm0 = vcmask 130048   ;;  %v128_v18 = vlaneseq }
  0x46   :  { %213 = vmatprep.mubr.bf16.mxu0 %v2418_v3  ;;  %286 = vmatprep.mubr.bf16.mxu1 %v2418_v3  ;;  %v1539_v4 = vld [vmem:[#allocation12] ss:$16 sps:$4 sm:$0xff]   ;;  %v1540_v5 = vld [vmem:[#allocation12 + $0x8] ss:$16 sps:$4 sm:$0xff]  }
  0x47   :  { %181 = vmatprep.subr.bf16.mxu0 %v1535_v1  ;;  %v110_v6 = vld [vmem:[#allocation9] sm:$0xff]  ;;  %254 = vmatprep.subr.bf16.mxu1 %v1537_v2  ;;  %v111_v7 = vld [vmem:[#allocation9 + $0x8] sm:$0xff]  ;;  %v112_v9 = vld [vmem:[#allocation9 + $0x10] sm:$0xff]  ;;  %v129_v19 = vshrl.u32 %v128_v18, 7 }
  0x48   :  { %182 = vmatpush1.bf16.msra.mxu0 %v1539_v4  ;;  %255 = vmatpush1.bf16.msra.mxu1 %v1540_v5  ;;  %v118_v8 = vpack.c.bf16 %v111_v7, %v110_v6  ;;  %v113_v10 = vld [vmem:[#allocation9 + $0x18] sm:$0xff]  ;;  %v114_v12 = vld [vmem:[#allocation9 + $0x20] sm:$0xff]  ;;  %v115_v13 = vld [vmem:[#allocation9 + $0x28] sm:$0xff] }
  0x49   :  { %v119_v11 = vpack.c.bf16 %v113_v10, %v112_v9  ;;  %v120_v14 = vpack.c.bf16 %v115_v13, %v114_v12  ;;  %v116_v15 = vld [vmem:[#allocation9 + $0x30] sm:$0xff]  ;;  %v117_v16 = vld [vmem:[#allocation9 + $0x38] sm:$0xff]  ;;  %v130_v20 = vsub.s32 0, %v129_v19  ;;  %v138_v21 = vsub.s32 2, %v129_v19 }
  0x4a   :  { %v121_v17 = vpack.c.bf16 %v117_v16, %v116_v15  ;;  %v126_v22 = vld [vmem:[%s2415_s4] sm:$0xf]  ;;  %v134_v23 = vsub.s32 1, %v129_v19  ;;  %v142_v24 = vsub.s32 3, %v129_v19 }
  0x4b   :  { %1480 = vmatmul.mubr.msk.bf16.vlgmr.msra.gmra.mrb[0].mxu0 %vm168_vm0, %v118_v8  ;;  %1484 = vmatmul.mubr.msk.bf16.vlgmr.msra.gmra.mrb[0].mxu1 %vm168_vm0, %v118_v8  ;;  %v131_v25 = vrot.slane %v126_v22, %v130_v20  ;;  %v139_v26 = vrot.slane %v126_v22, %v138_v21 }
  0x4c   :  { %223 = vmatprep.mubr.bf16.mxu0 %v2418_v3  ;;  %296 = vmatprep.mubr.bf16.mxu1 %v2418_v3  ;;  %v1890_v27 = vrot.slane %v126_v22, %v134_v23  ;;  %v1892_v28 = vrot.slane %v126_v22, %v142_v24 }
  0x53   :  { %1481 = vmatmul.mubr.msk.bf16.gmra.mrb[4].mxu0 %vm168_vm0, %v119_v11  ;;  %1485 = vmatmul.mubr.msk.bf16.gmra.mrb[4].mxu1 %vm168_vm0, %v119_v11 }
  0x54   :  { %233 = vmatprep.mubr.bf16.mxu0 %v2418_v3  ;;  %306 = vmatprep.mubr.bf16.mxu1 %v2418_v3 }
  0x5b   :  { %1482 = vmatmul.mubr.msk.bf16.gmra.mrb[8].mxu0 %vm168_vm0, %v120_v14  ;;  %1486 = vmatmul.mubr.msk.bf16.gmra.mrb[8].mxu1 %vm168_vm0, %v120_v14 }
  0x5c   :  { %243 = vmatprep.mubr.bf16.mxu0 %v2418_v3  ;;  %316 = vmatprep.mubr.bf16.mxu1 %v2418_v3 }
  0x63   :  { %1483 = vmatmul.mubr.msk.bf16.gmra.mrb[12].mxu0 %vm168_vm0, %v121_v17  ;;  %1487 = vmatmul.mubr.msk.bf16.gmra.mrb[12].mxu1 %vm168_vm0, %v121_v17 }
 0x11e   :  { %v215_v29 = vpop.f32.mrb[0].mxu0  ;;  %v288_v30 = vpop.f32.mrb[0].mxu1 }
 0x11f   :  { %v1894_v31 = vadd.f32 %v215_v29, %v131_v25  ;;  %v1896_v32 = vadd.f32 %v288_v30, %v139_v26  ;;  %v217_v33 = vpop.f32.mrb[1].mxu0  ;;  %v290_v34 = vpop.f32.mrb[1].mxu1 }
 0x120   :  { %v1899_v35 = vadd.f32 %v217_v33, %v1890_v27  ;;  %v1902_v36 = vadd.f32 %v290_v34, %v1892_v28  ;;  %v219_v37 = vpop.f32.mrb[2].mxu0  ;;  %v292_v38 = vpop.f32.mrb[2].mxu1 }
 0x121   :  { %v1904_v39 = vadd.f32 %v219_v37, %v131_v25  ;;  %v1906_v40 = vadd.f32 %v292_v38, %v139_v26  ;;  %v221_v41 = vpop.f32.mrb[3].mxu0  ;;  %v294_v42 = vpop.f32.mrb[3].mxu1 }
 0x122   :  { %v1909_v43 = vadd.f32 %v221_v41, %v1890_v27  ;;  %v1912_v44 = vadd.f32 %v294_v42, %v1892_v28 }
 0x126   :  { %v225_v45 = vpop.f32.mrb[4].mxu0  ;;  %v298_v46 = vpop.f32.mrb[4].mxu1 }
 0x127   :  { %v1914_v47 = vadd.f32 %v225_v45, %v131_v25  ;;  %v1916_v48 = vadd.f32 %v298_v46, %v139_v26  ;;  %v227_v49 = vpop.f32.mrb[5].mxu0  ;;  %v300_v50 = vpop.f32.mrb[5].mxu1 }
 0x128   :  { %v1919_v51 = vadd.f32 %v227_v49, %v1890_v27  ;;  %v1922_v52 = vadd.f32 %v300_v50, %v1892_v28  ;;  %v229_v53 = vpop.f32.mrb[6].mxu0  ;;  %v302_v54 = vpop.f32.mrb[6].mxu1 }
 0x129   :  { %v1924_v55 = vadd.f32 %v229_v53, %v131_v25  ;;  %v1926_v56 = vadd.f32 %v302_v54, %v139_v26  ;;  %v231_v57 = vpop.f32.mrb[7].mxu0  ;;  %v304_v58 = vpop.f32.mrb[7].mxu1 }
 0x12a   :  { %v1929_v59 = vadd.f32 %v231_v57, %v1890_v27  ;;  %v1932_v60 = vadd.f32 %v304_v58, %v1892_v28 }
 0x12b   :  { %2420 = vst [vmem:[#allocation21_spill] sm:$0xff] %v1926_v56 }
 0x12c   :  { %2421 = vst [vmem:[#allocation22_spill] sm:$0xff] %v1929_v59  ;;  %2422 = vst [vmem:[#allocation23_spill] sm:$0xff] %v1932_v60 }
 0x12e   :  { %v235_v61 = vpop.f32.mrb[8].mxu0  ;;  %v308_v62 = vpop.f32.mrb[8].mxu1 }
 0x12f   :  { %v1934_v63 = vadd.f32 %v235_v61, %v131_v25  ;;  %v1936_v0 = vadd.f32 %v308_v62, %v139_v26  ;;  %v237_v1 = vpop.f32.mrb[9].mxu0  ;;  %v310_v2 = vpop.f32.mrb[9].mxu1 }
 0x130   :  { %v1939_v4 = vadd.f32 %v237_v1, %v1890_v27  ;;  %v1942_v5 = vadd.f32 %v310_v2, %v1892_v28  ;;  %v239_v6 = vpop.f32.mrb[10].mxu0  ;;  %v312_v7 = vpop.f32.mrb[10].mxu1 }
 0x131   :  { %2423 = vst [vmem:[#allocation24_spill] sm:$0xff] %v1934_v63  ;;  %2424 = vst [vmem:[#allocation25_spill] sm:$0xff] %v1936_v0  ;;  %v1944_v8 = vadd.f32 %v239_v6, %v131_v25  ;;  %v1946_v9 = vadd.f32 %v312_v7, %v139_v26  ;;  %v241_v10 = vpop.f32.mrb[11].mxu0  ;;  %v314_v11 = vpop.f32.mrb[11].mxu1 }
 0x132   :  { %2425 = vst [vmem:[#allocation26_spill] sm:$0xff] %v1939_v4  ;;  %2426 = vst [vmem:[#allocation27_spill] sm:$0xff] %v1942_v5  ;;  %v1949_v12 = vadd.f32 %v241_v10, %v1890_v27  ;;  %v1952_v13 = vadd.f32 %v314_v11, %v1892_v28 }
 0x133   :  { %2427 = vst [vmem:[#allocation28_spill] sm:$0xff] %v1944_v8  ;;  %2428 = vst [vmem:[#allocation29_spill] sm:$0xff] %v1946_v9 }
 0x134   :  { %2429 = vst [vmem:[#allocation30_spill] sm:$0xff] %v1949_v12  ;;  %2430 = vst [vmem:[#allocation31_spill] sm:$0xff] %v1952_v13 }
 0x136   :  { %v245_v14 = vpop.f32.mrb[12].mxu0  ;;  %v318_v15 = vpop.f32.mrb[12].mxu1 }
 0x137   :  { %v1954_v16 = vadd.f32 %v245_v14, %v131_v25  ;;  %v1956_v17 = vadd.f32 %v318_v15, %v139_v26  ;;  %v247_v18 = vpop.f32.mrb[13].mxu0  ;;  %v320_v19 = vpop.f32.mrb[13].mxu1 }
 0x138   :  { %v1959_v20 = vadd.f32 %v247_v18, %v1890_v27  ;;  %v1962_v21 = vadd.f32 %v320_v19, %v1892_v28  ;;  %v249_v22 = vpop.f32.mrb[14].mxu0  ;;  %v322_v23 = vpop.f32.mrb[14].mxu1 }
 0x139   :  { %2431 = vst [vmem:[#allocation32_spill] sm:$0xff] %v1954_v16  ;;  %2432 = vst [vmem:[#allocation33_spill] sm:$0xff] %v1956_v17  ;;  %v1964_v24 = vadd.f32 %v249_v22, %v131_v25  ;;  %v1966_v29 = vadd.f32 %v322_v23, %v139_v26  ;;  %v251_v30 = vpop.f32.mrb[15].mxu0  ;;  %v324_v33 = vpop.f32.mrb[15].mxu1 }
 0x13a   :  { %2433 = vst [vmem:[#allocation34_spill] sm:$0xff] %v1959_v20  ;;  %2434 = vst [vmem:[#allocation35_spill] sm:$0xff] %v1962_v21  ;;  %v1969_v34 = vadd.f32 %v251_v30, %v1890_v27  ;;  %v1972_v37 = vadd.f32 %v324_v33, %v1892_v28 }
 0x13b   :  { %2435 = vst [vmem:[#allocation36_spill] sm:$0xff] %v1964_v24  ;;  %2436 = vst [vmem:[#allocation37_spill] sm:$0xff] %v1966_v29 }
 0x13c   :  { %2437 = vst [vmem:[#allocation38_spill] sm:$0xff] %v1969_v34  ;;  %2438 = vst [vmem:[#allocation39_spill] sm:$0xff] %v1972_v37 }
 0x13d   :  { %1773 = dma.done.wait [#allocation6], 4096 }
 0x13e   :  { %1774 = vsyncadd [#allocation6], 4294963200  ;;  %438 = vmatprep.mubr.bf16.mxu0 %v2418_v3  ;;  %479 = vmatprep.mubr.bf16.mxu1 %v2418_v3  ;;  %v1978_v25 = vld [vmem:[#allocation5 + $0x8] sm:$0xff]  ;;  %v1980_v26 = vld [vmem:[#allocation5] sm:$0xff] }
 0x13f   :  { %1541 = vset.pattern.permute.xlu0 %v2418_v3  ;;  %1542 = vset.pattern.permute.xlu1 %v2418_v3  ;;  %v1982_v38 = vld [vmem:[#allocation5 + $0x28] sm:$0xff]  ;;  %v1986_v27 = vld [vmem:[#allocation5 + $0x18] sm:$0xff]  ;;  %v1989_v28 = vld [vmem:[#allocation5 + $0x20] sm:$0xff] }
 0x140   :  { %406 = vmatprep.subr.bf16.mxu0 %v1978_v25  ;;  %447 = vmatprep.subr.bf16.mxu1 %v1986_v27  ;;  %v1992_v41 = vld [vmem:[#allocation5 + $0x10] sm:$0xff]  ;;  %v1994_v42 = vld [vmem:[#allocation5 + $0x38] sm:$0xff]  ;;  %v1996_v45 = vld [vmem:[#allocation5 + $0x48] sm:$0xff] }
 0x141   :  { %407 = vmatpush1.bf16.msra.mxu0 %v1980_v26  ;;  %448 = vmatpush1.bf16.msra.mxu1 %v1992_v41  ;;  %v2000_v46 = vld [vmem:[#allocation5 + $0x30] sm:$0xff]  ;;  %v2003_v49 = vld [vmem:[#allocation5 + $0x58] sm:$0xff]  ;;  %v2006_v50 = vld [vmem:[#allocation5 + $0x40] sm:$0xff] }
 0x142   :  { %408 = vmatprep.subr.bf16.mxu0 %v1982_v38  ;;  %449 = vmatprep.subr.bf16.mxu1 %v1994_v42  ;;  %v2008_v53 = vld [vmem:[#allocation5 + $0x68] sm:$0xff]  ;;  %v2012_v54 = vld [vmem:[#allocation5 + $0x50] sm:$0xff]  ;;  %v2015_v57 = vld [vmem:[#allocation5 + $0x78] sm:$0xff] }
 0x143   :  { %v2018_v58 = vld [vmem:[#allocation5 + $0x60] sm:$0xff]  ;;  %v2023_v61 = vld [vmem:[%s2413_s2] sm:$0xff]  ;;  %v2025_v62 = vld [vmem:[#allocation5 + $0x88] sm:$0xff] }
 0x144   :  { %vm517_vm1 = vcmp.gt.s32.totalorder %v2023_v61, 0  ;;  %vm645_vm2 = vcmp.gt.s32.totalorder %v2023_v61, 1  ;;  %v2031_v1 = vld [vmem:[#allocation5 + $0x70] sm:$0xff]  ;;  %v2035_v6 = vld [vmem:[#allocation5 + $0x98] sm:$0xff]  ;;  %v2038_v7 = vld [vmem:[#allocation5 + $0x80] sm:$0xff]  ;;  %vm1032_vm3 = vcmp.gt.s32.totalorder %v2023_v61, 4 }
 0x145   :  { %409 = vmatpush1.bf16.msra.mxu0 %v1989_v28  ;;  %450 = vmatpush1.bf16.msra.mxu1 %v2000_v46  ;;  %v518_v2 = vsel %vm517_vm1, 1, %v2418_v3  ;;  %v646_v10 = vsel %vm645_vm2, 1, %v2418_v3  ;;  %v2041_v11 = vld [vmem:[#allocation5 + $0xa8] sm:$0xff]  ;;  %v2046_v14 = vld [vmem:[#allocation5 + $0x90] sm:$0xff]  ;;  %v2049_v15 = vld [vmem:[#allocation5 + $0xb8] sm:$0xff]  ;;  %v1033_v19 = vsel %vm1032_vm3, 1, %v2418_v3 }
 0x146   :  { %410 = vmatprep.subr.bf16.mxu0 %v1996_v45  ;;  %451 = vmatprep.subr.bf16.mxu1 %v2003_v49  ;;  %v2052_v18 = vld [vmem:[#allocation5 + $0xa0] sm:$0xff]  ;;  %v2055_v22 = vld [vmem:[#allocation5 + $0xc8] sm:$0xff]  ;;  %vm1290_vm4 = vcmp.gt.s32.totalorder %v2023_v61, 6  ;;  %v2060_v23 = vld [vmem:[#allocation5 + $0xb0] sm:$0xff]  ;;  %vm774_vm6 = vcmp.gt.s32.totalorder %v2023_v61, 2  ;;  %vm903_vm7 = vcmp.gt.s32.totalorder %v2023_v61, 3 }
 0x147   :  { %520 = vperm.xlu0 %1541, %v518_v2   ;;  %v2063_v30 = vld [vmem:[#allocation5 + $0xd8] sm:$0xff]  ;;  %v2066_v33 = vld [vmem:[#allocation5 + $0xc0] sm:$0xff]  ;;  %v1291_v2 = vsel %vm1290_vm4, 1, %v2418_v3  ;;  %v2073_v29 = vld [vmem:[#allocation5 + $0xd0] sm:$0xff]  ;;  %vm1161_vm8 = vcmp.gt.s32.totalorder %v2023_v61, 5  ;;  %vm1419_vm9 = vcmp.gt.s32.totalorder %v2023_v61, 7 }
 0x148   :  { %v2076_v37 = vld [vmem:[#allocation2] sm:$0xff]  ;;  %v2078_v34 = vld [vmem:[#allocation5 + $0xf8] sm:$0xff] }
 0x149   :  { %411 = vmatpush1.bf16.msra.mxu0 %v2006_v50  ;;  %452 = vmatpush1.bf16.msra.mxu1 %v2012_v54  ;;  %v405_v3 = vpack.c.bf16 %v2076_v37, %v2076_v37  ;;  %v2087_v24 = vld [vmem:[#allocation5 + $0xf0] sm:$0xff] }
 0x14a   :  { %412 = vmatprep.subr.bf16.mxu0 %v2008_v53  ;;  %453 = vmatprep.subr.bf16.mxu1 %v2015_v57 }
 0x14b   :  { %648 = vperm.xlu0 %1541, %v646_v10   ;;  %v2069_v10 = vld [vmem:[#allocation5 + $0xe8] sm:$0xff] }
 0x14d   :  { %413 = vmatpush1.bf16.msra.mxu0 %v2018_v58  ;;  %454 = vmatpush1.bf16.msra.mxu1 %v2031_v1 }
 0x14e   :  { %414 = vmatprep.subr.bf16.mxu0 %v2025_v62  ;;  %455 = vmatprep.subr.bf16.mxu1 %v2035_v6 }
 0x14f   :  { %1035 = vperm.xlu0 %1541, %v1033_v19   ;;  %v2081_v19 = vld [vmem:[#allocation5 + $0xe0] sm:$0xff] }
 0x151   :  { %415 = vmatpush1.bf16.msra.mxu0 %v2038_v7  ;;  %456 = vmatpush1.bf16.msra.mxu1 %v2046_v14 }
 0x152   :  { %416 = vmatprep.subr.bf16.mxu0 %v2041_v11  ;;  %457 = vmatprep.subr.bf16.mxu1 %v2049_v15 }
 0x153   :  { %1293 = vperm.xlu0 %1541, %v1291_v2   ;;  %v2439_v2 = vmov 0  }
 0x155   :  { %417 = vmatpush1.bf16.msra.mxu0 %v2052_v18  ;;  %458 = vmatpush1.bf16.msra.mxu1 %v2060_v23 }
 0x156   :  { %418 = vmatprep.subr.bf16.mxu0 %v2055_v22  ;;  %459 = vmatprep.subr.bf16.mxu1 %v2063_v30 }
 0x159   :  { %419 = vmatpush1.bf16.msra.mxu0 %v2066_v33  ;;  %460 = vmatpush1.bf16.msra.mxu1 %v2073_v29 }
 0x15a   :  { %420 = vmatprep.subr.bf16.mxu0 %v2069_v10  ;;  %461 = vmatprep.subr.bf16.mxu1 %v2078_v34 }
 0x15d   :  { %421 = vmatpush1.bf16.msra.mxu0 %v2081_v19  ;;  %462 = vmatpush1.bf16.msra.mxu1 %v2087_v24 }
 0x15e   :  { %533 = vmatprep.subr.bf16.mxu0 %v1978_v25  ;;  %574 = vmatprep.subr.bf16.mxu1 %v1986_v27 }
 0x160   :  { %439 = vmatmul.mubr.bf16.vlgmr.msra.gmra.mrb[16].mxu0 %v405_v3  ;;  %480 = vmatmul.mubr.bf16.vlgmr.msra.gmra.mrb[16].mxu1 %v405_v3 }
 0x161   :  { %534 = vmatpush1.bf16.msra.mxu0 %v1980_v26  ;;  %565 = vmatprep.mubr.bf16.mxu0 %v2439_v2 }
 0x162   :  { %535 = vmatprep.subr.bf16.mxu0 %v1982_v38  ;;  %575 = vmatpush1.bf16.msra.mxu1 %v1992_v41 }
 0x163   :  { %606 = vmatprep.mubr.bf16.mxu1 %v2439_v2  ;;  %576 = vmatprep.subr.bf16.mxu1 %v1994_v42 }
 0x165   :  { %536 = vmatpush1.bf16.msra.mxu0 %v1989_v28 }
 0x166   :  { %537 = vmatprep.subr.bf16.mxu0 %v1996_v45  ;;  %577 = vmatpush1.bf16.msra.mxu1 %v2000_v46 }
 0x167   :  { %578 = vmatprep.subr.bf16.mxu1 %v2003_v49 }
 0x169   :  { %538 = vmatpush1.bf16.msra.mxu0 %v2006_v50 }
 0x16a   :  { %539 = vmatprep.subr.bf16.mxu0 %v2008_v53  ;;  %579 = vmatpush1.bf16.msra.mxu1 %v2012_v54 }
 0x16b   :  { %580 = vmatprep.subr.bf16.mxu1 %v2015_v57 }
 0x16d   :  { %540 = vmatpush1.bf16.msra.mxu0 %v2018_v58 }
 0x16e   :  { %541 = vmatprep.subr.bf16.mxu0 %v2025_v62  ;;  %581 = vmatpush1.bf16.msra.mxu1 %v2031_v1 }
 0x16f   :  { %582 = vmatprep.subr.bf16.mxu1 %v2035_v6 }
 0x171   :  { %542 = vmatpush1.bf16.msra.mxu0 %v2038_v7 }
 0x172   :  { %543 = vmatprep.subr.bf16.mxu0 %v2041_v11  ;;  %583 = vmatpush1.bf16.msra.mxu1 %v2046_v14 }
 0x173   :  { %584 = vmatprep.subr.bf16.mxu1 %v2049_v15 }
 0x175   :  { %544 = vmatpush1.bf16.msra.mxu0 %v2052_v18 }
 0x176   :  { %545 = vmatprep.subr.bf16.mxu0 %v2055_v22  ;;  %585 = vmatpush1.bf16.msra.mxu1 %v2060_v23 }
 0x177   :  { %586 = vmatprep.subr.bf16.mxu1 %v2063_v30 }
 0x179   :  { %546 = vmatpush1.bf16.msra.mxu0 %v2066_v33 }
 0x17a   :  { %547 = vmatprep.subr.bf16.mxu0 %v2069_v10  ;;  %587 = vmatpush1.bf16.msra.mxu1 %v2073_v29 }
 0x17b   :  { %588 = vmatprep.subr.bf16.mxu1 %v2078_v34 }
 0x17d   :  { %548 = vmatpush1.bf16.msra.mxu0 %v2081_v19 }
 0x17e   :  { %662 = vmatprep.subr.bf16.mxu0 %v1978_v25  ;;  %589 = vmatpush1.bf16.msra.mxu1 %v2087_v24 }
 0x17f   :  { %703 = vmatprep.subr.bf16.mxu1 %v1986_v27 }
 0x233   :  { %v440_v3 = vpop.f32.mrb[16].mxu0  ;;  %v481_v9 = vpop.f32.mrb[16].mxu1 }
 0x234   :  { %v488_v17 = vadd.f32 %v440_v3, %v1894_v31  ;;  %v442_v21 = vpop.f32.mrb[17].mxu0  ;;  %v483_v8 = vpop.f32.mrb[17].mxu1  ;;  %v490_v60 = vadd.f32 %v481_v9, %v1896_v32 }
 0x235   :  { %v489_v20 = vadd.f32 %v442_v21, %v1899_v35  ;;  %v444_v16 = vpop.f32.mrb[18].mxu0  ;;  %v485_v5 = vpop.f32.mrb[18].mxu1  ;;  %v491_v63 = vadd.f32 %v483_v8, %v1902_v36 }
 0x236   :  { %v1488_v13 = vmul.f32 -1.442695, %v488_v17  ;;  %v445_v12 = vpop.f32.mrb[19].mxu0  ;;  %v486_v4 = vpop.f32.mrb[19].mxu1  ;;  %v400_v17 = vld [vmem:[#allocation3] sm:$0xff] }
 0x237   :  { %v1489_v0 = vmul.f32 -1.442695, %v489_v20  ;;  %v1490_v56 = vmul.f32 -1.442695, %v491_v63  ;;  %v521_v4 = vpop.permute.xlu0 %520 }
 0x238   :  { %1543 = vpow2.f32 %v1488_v13  ;;  %vm522_vm5 = vcmp.eq.s32.totalorder %v521_v4, 1 }
 0x239   :  { %1545 = vpow2.f32 %v1489_v0 }
 0x23a   :  { %1547 = vpow2.f32 %v1490_v56 }
 0x23b   :  { %1549 = vtanh.f32 %v490_v60 }
 0x242   :  { %v1544_v59 = vpop.eup %1543 }
 0x243   :  { %v1546_v31 = vpop.eup %1545  ;;  %v495_v3 = vadd.f32 1.0, %v1544_v59 }
 0x244   :  { %v501_v35 = vadd.f32 1.0, %v1546_v31  ;;  %v1548_v12 = vpop.eup %1547  ;;  %v904_v31 = vsel %vm903_vm7, 1, %v2439_v2 }
 0x245   :  { %1551 = vrcp.f32 %v495_v3  ;;  %v1550_v16 = vpop.eup %1549  ;;  %v508_v13 = vadd.f32 1.0, %v1548_v12  ;;  %v1162_v3 = vsel %vm1161_vm8, 1, %v2439_v2 }
 0x246   :  { %1553 = vrcp.f32 %v501_v35  ;;  %v1420_v35 = vsel %vm1419_vm9, 1, %v2439_v2 }
 0x247   :  { %1555 = vrcp.f32 %v508_v13 }
 0x24f   :  { %v1552_v5 = vpop.eup %1551 }
 0x250   :  { %v1554_v0 = vpop.eup %1553  ;;  %v512_v20 = vmul.f32 %v1552_v5, %v1550_v16 }
 0x251   :  { %v511_v36 = vmul.f32 %v1554_v0, %v400_v17  ;;  %v1556_v59 = vpop.eup %1555 }
 0x253   :  { %v513_v32 = vadd.f32 %v512_v20, %v511_v36 }
 0x255   :  { %1557 = vtanh.f32 %v513_v32  ;;  %v2131_v56 = vsel %vm522_vm5, %v513_v32, %v400_v17 }
 0x25f   :  { %v1558_v60 = vpop.eup %1557 }
 0x260   :  { %v515_v63 = vmul.f32 %v1558_v60, %v1556_v59 }
 0x262   :  { %v2134_v8 = vsel %vm522_vm5, %v515_v63, %v2076_v37  ;;  %v525_v9 = vsel %vm522_vm5, %v515_v63, 0.0  ;;  %v775_v37 = vsel %vm774_vm6, 1, %v2439_v2 }
 0x263   :  { %526 = vst [vmem:[#allocation14] sm:$0xff] %v525_v9  ;;  %v532_v21 = vpack.c.bf16 %v2134_v8, %v2134_v8  ;;  %777 = vperm.xlu1 %1542, %v775_v37  }
 0x265   :  { %566 = vmatmul.mubr.bf16.vlgmr.msra.gmra.mrb[20].mxu0 %v532_v21  ;;  %607 = vmatmul.mubr.bf16.vlgmr.msra.gmra.mrb[20].mxu1 %v532_v21 }
 0x266   :  { %663 = vmatpush1.bf16.msra.mxu0 %v1980_v26  ;;  %704 = vmatpush1.bf16.msra.mxu1 %v1992_v41 }
 0x267   :  { %664 = vmatprep.subr.bf16.mxu0 %v1982_v38  ;;  %705 = vmatprep.subr.bf16.mxu1 %v1994_v42 }
 0x268   :  { %694 = vmatprep.mubr.bf16.mxu0 %v2439_v2  ;;  %735 = vmatprep.mubr.bf16.mxu1 %v2439_v2 }
 0x269   :  { %906 = vperm.xlu1 %1542, %v904_v31  }
 0x26a   :  { %665 = vmatpush1.bf16.msra.mxu0 %v1989_v28  ;;  %706 = vmatpush1.bf16.msra.mxu1 %v2000_v46 }
 0x26b   :  { %666 = vmatprep.subr.bf16.mxu0 %v1996_v45  ;;  %707 = vmatprep.subr.bf16.mxu1 %v2003_v49 }
 0x26d   :  { %1164 = vperm.xlu1 %1542, %v1162_v3  }
 0x26e   :  { %667 = vmatpush1.bf16.msra.mxu0 %v2006_v50  ;;  %708 = vmatpush1.bf16.msra.mxu1 %v2012_v54 }
 0x26f   :  { %668 = vmatprep.subr.bf16.mxu0 %v2008_v53  ;;  %709 = vmatprep.subr.bf16.mxu1 %v2015_v57 }
 0x271   :  { %1422 = vperm.xlu1 %1542, %v1420_v35  }
 0x272   :  { %669 = vmatpush1.bf16.msra.mxu0 %v2018_v58  ;;  %710 = vmatpush1.bf16.msra.mxu1 %v2031_v1 }
 0x273   :  { %670 = vmatprep.subr.bf16.mxu0 %v2025_v62  ;;  %711 = vmatprep.subr.bf16.mxu1 %v2035_v6 }
 0x276   :  { %671 = vmatpush1.bf16.msra.mxu0 %v2038_v7  ;;  %712 = vmatpush1.bf16.msra.mxu1 %v2046_v14 }
 0x277   :  { %672 = vmatprep.subr.bf16.mxu0 %v2041_v11  ;;  %713 = vmatprep.subr.bf16.mxu1 %v2049_v15 }
 0x27a   :  { %673 = vmatpush1.bf16.msra.mxu0 %v2052_v18  ;;  %714 = vmatpush1.bf16.msra.mxu1 %v2060_v23 }
 0x27b   :  { %674 = vmatprep.subr.bf16.mxu0 %v2055_v22  ;;  %715 = vmatprep.subr.bf16.mxu1 %v2063_v30 }
 0x27e   :  { %675 = vmatpush1.bf16.msra.mxu0 %v2066_v33  ;;  %716 = vmatpush1.bf16.msra.mxu1 %v2073_v29 }
 0x27f   :  { %676 = vmatprep.subr.bf16.mxu0 %v2069_v10  ;;  %717 = vmatprep.subr.bf16.mxu1 %v2078_v34 }
 0x282   :  { %677 = vmatpush1.bf16.msra.mxu0 %v2081_v19  ;;  %718 = vmatpush1.bf16.msra.mxu1 %v2087_v24 }
 0x283   :  { %791 = vmatprep.subr.bf16.mxu0 %v1978_v25  ;;  %832 = vmatprep.subr.bf16.mxu1 %v1986_v27 }
 0x338   :  { %v567_v12 = vpop.f32.mrb[20].mxu0  ;;  %v608_v16 = vpop.f32.mrb[20].mxu1 }
 0x339   :  { %v615_v17 = vadd.f32 %v567_v12, %v1904_v39  ;;  %v569_v5 = vpop.f32.mrb[21].mxu0  ;;  %v610_v13 = vpop.f32.mrb[21].mxu1  ;;  %v617_v9 = vadd.f32 %v608_v16, %v1906_v40 }
 0x33a   :  { %v616_v4 = vadd.f32 %v569_v5, %v1909_v43  ;;  %v571_v0 = vpop.f32.mrb[22].mxu0  ;;  %v612_v20 = vpop.f32.mrb[22].mxu1  ;;  %v618_v61 = vadd.f32 %v610_v13, %v1912_v44 }
 0x33b   :  { %v1491_v36 = vmul.f32 -1.442695, %v615_v17  ;;  %v572_v32 = vpop.f32.mrb[23].mxu0  ;;  %v613_v59 = vpop.f32.mrb[23].mxu1 }
 0x33c   :  { %v1492_v60 = vmul.f32 -1.442695, %v616_v4  ;;  %v1493_v63 = vmul.f32 -1.442695, %v618_v61  ;;  %v649_v44 = vpop.permute.xlu0 %648 }
 0x33d   :  { %1559 = vpow2.f32 %v1491_v36  ;;  %vm650_vm10 = vcmp.eq.s32.totalorder %v649_v44, 1 }
 0x33e   :  { %1561 = vpow2.f32 %v1492_v60 }
 0x33f   :  { %1563 = vpow2.f32 %v1493_v63 }
 0x340   :  { %1565 = vtanh.f32 %v617_v9 }
 0x347   :  { %v1560_v21 = vpop.eup %1559 }
 0x348   :  { %v1562_v37 = vpop.eup %1561  ;;  %v622_v39 = vadd.f32 1.0, %v1560_v21 }
 0x349   :  { %v628_v31 = vadd.f32 1.0, %v1562_v37  ;;  %v1564_v43 = vpop.eup %1563 }
 0x34a   :  { %1567 = vrcp.f32 %v622_v39  ;;  %v1566_v3 = vpop.eup %1565  ;;  %v635_v5 = vadd.f32 1.0, %v1564_v43 }
 0x34b   :  { %1569 = vrcp.f32 %v628_v31 }
 0x34c   :  { %1571 = vrcp.f32 %v635_v5 }
 0x354   :  { %v1568_v35 = vpop.eup %1567 }
 0x355   :  { %v1570_v12 = vpop.eup %1569  ;;  %v639_v17 = vmul.f32 %v1568_v35, %v1566_v3 }
 0x356   :  { %v638_v4 = vmul.f32 %v1570_v12, %v2131_v56  ;;  %v1572_v16 = vpop.eup %1571 }
 0x358   :  { %v640_v13 = vadd.f32 %v639_v17, %v638_v4 }
 0x35a   :  { %1573 = vtanh.f32 %v640_v13  ;;  %v2186_v40 = vsel %vm650_vm10, %v640_v13, %v2131_v56 }
 0x364   :  { %v1574_v0 = vpop.eup %1573 }
 0x365   :  { %v642_v20 = vmul.f32 %v1574_v0, %v1572_v16  ;;  %v778_v0 = vpop.permute.xlu1 %777 }
 0x366   :  { %vm779_vm11 = vcmp.eq.s32.totalorder %v778_v0, 1 }
 0x367   :  { %v2189_v36 = vsel %vm650_vm10, %v642_v20, %v2134_v8  ;;  %v653_v32 = vsel %vm650_vm10, %v642_v20, 0.0 }
 0x368   :  { %655 = vst [vmem:[#allocation14 + $0x8] sm:$0xff] %v653_v32  ;;  %v661_v59 = vpack.c.bf16 %v2189_v36, %v2189_v36 }
 0x36a   :  { %695 = vmatmul.mubr.bf16.vlgmr.msra.gmra.mrb[24].mxu0 %v661_v59  ;;  %736 = vmatmul.mubr.bf16.vlgmr.msra.gmra.mrb[24].mxu1 %v661_v59 }
 0x36b   :  { %792 = vmatpush1.bf16.msra.mxu0 %v1980_v26  ;;  %833 = vmatpush1.bf16.msra.mxu1 %v1992_v41 }
 0x36c   :  { %793 = vmatprep.subr.bf16.mxu0 %v1982_v38  ;;  %834 = vmatprep.subr.bf16.mxu1 %v1994_v42 }
 0x36d   :  { %823 = vmatprep.mubr.bf16.mxu0 %v2439_v2  ;;  %864 = vmatprep.mubr.bf16.mxu1 %v2439_v2 }
 0x36f   :  { %794 = vmatpush1.bf16.msra.mxu0 %v1989_v28  ;;  %835 = vmatpush1.bf16.msra.mxu1 %v2000_v46 }
 0x370   :  { %795 = vmatprep.subr.bf16.mxu0 %v1996_v45  ;;  %836 = vmatprep.subr.bf16.mxu1 %v2003_v49 }
 0x373   :  { %796 = vmatpush1.bf16.msra.mxu0 %v2006_v50  ;;  %837 = vmatpush1.bf16.msra.mxu1 %v2012_v54 }
 0x374   :  { %797 = vmatprep.subr.bf16.mxu0 %v2008_v53  ;;  %838 = vmatprep.subr.bf16.mxu1 %v2015_v57 }
 0x377   :  { %798 = vmatpush1.bf16.msra.mxu0 %v2018_v58  ;;  %839 = vmatpush1.bf16.msra.mxu1 %v2031_v1 }
 0x378   :  { %799 = vmatprep.subr.bf16.mxu0 %v2025_v62  ;;  %840 = vmatprep.subr.bf16.mxu1 %v2035_v6 }
 0x37b   :  { %800 = vmatpush1.bf16.msra.mxu0 %v2038_v7  ;;  %841 = vmatpush1.bf16.msra.mxu1 %v2046_v14 }
 0x37c   :  { %801 = vmatprep.subr.bf16.mxu0 %v2041_v11  ;;  %842 = vmatprep.subr.bf16.mxu1 %v2049_v15 }
 0x37f   :  { %802 = vmatpush1.bf16.msra.mxu0 %v2052_v18  ;;  %843 = vmatpush1.bf16.msra.mxu1 %v2060_v23 }
 0x380   :  { %803 = vmatprep.subr.bf16.mxu0 %v2055_v22  ;;  %844 = vmatprep.subr.bf16.mxu1 %v2063_v30 }
 0x383   :  { %804 = vmatpush1.bf16.msra.mxu0 %v2066_v33  ;;  %845 = vmatpush1.bf16.msra.mxu1 %v2073_v29 }
 0x384   :  { %805 = vmatprep.subr.bf16.mxu0 %v2069_v10  ;;  %846 = vmatprep.subr.bf16.mxu1 %v2078_v34 }
 0x387   :  { %806 = vmatpush1.bf16.msra.mxu0 %v2081_v19  ;;  %847 = vmatpush1.bf16.msra.mxu1 %v2087_v24 }
 0x388   :  { %920 = vmatprep.subr.bf16.mxu0 %v1978_v25  ;;  %961 = vmatprep.subr.bf16.mxu1 %v1986_v27 }
 0x43d   :  { %v696_v56 = vpop.f32.mrb[24].mxu0  ;;  %v737_v8 = vpop.f32.mrb[24].mxu1 }
 0x43e   :  { %v744_v60 = vadd.f32 %v696_v56, %v1914_v47  ;;  %v698_v61 = vpop.f32.mrb[25].mxu0  ;;  %v739_v63 = vpop.f32.mrb[25].mxu1  ;;  %v746_v17 = vadd.f32 %v737_v8, %v1916_v48 }
 0x43f   :  { %v745_v9 = vadd.f32 %v698_v61, %v1919_v51  ;;  %v700_v21 = vpop.f32.mrb[26].mxu0  ;;  %v741_v37 = vpop.f32.mrb[26].mxu1  ;;  %v747_v35 = vadd.f32 %v739_v63, %v1922_v52 }
 0x440   :  { %v1494_v39 = vmul.f32 -1.442695, %v744_v60  ;;  %v701_v31 = vpop.f32.mrb[27].mxu0  ;;  %v742_v43 = vpop.f32.mrb[27].mxu1 }
 0x441   :  { %v1495_v3 = vmul.f32 -1.442695, %v745_v9  ;;  %v1496_v12 = vmul.f32 -1.442695, %v747_v35  ;;  %v2440_v43 = vld [vmem:[#allocation22_spill] sm:$0xff] }
 0x442   :  { %1575 = vpow2.f32 %v1494_v39 }
 0x443   :  { %1577 = vpow2.f32 %v1495_v3 }
 0x444   :  { %1579 = vpow2.f32 %v1496_v12 }
 0x445   :  { %1581 = vtanh.f32 %v746_v17 }
 0x44c   :  { %v1576_v5 = vpop.eup %1575 }
 0x44d   :  { %v1578_v4 = vpop.eup %1577  ;;  %v751_v47 = vadd.f32 1.0, %v1576_v5 }
 0x44e   :  { %v757_v44 = vadd.f32 1.0, %v1578_v4  ;;  %v1580_v51 = vpop.eup %1579 }
 0x44f   :  { %1583 = vrcp.f32 %v751_v47  ;;  %v1582_v13 = vpop.eup %1581  ;;  %v764_v32 = vadd.f32 1.0, %v1580_v51 }
 0x450   :  { %1585 = vrcp.f32 %v757_v44  ;;  %v2441_v44 = vld [vmem:[#allocation23_spill] sm:$0xff] }
 0x451   :  { %1587 = vrcp.f32 %v764_v32 }
 0x459   :  { %v1584_v16 = vpop.eup %1583 }
 0x45a   :  { %v1586_v20 = vpop.eup %1585  ;;  %v768_v59 = vmul.f32 %v1584_v16, %v1582_v13  ;;  %v2442_v16 = vld [vmem:[#allocation21_spill] sm:$0xff] }
 0x45b   :  { %v767_v52 = vmul.f32 %v1586_v20, %v2186_v40  ;;  %v1588_v8 = vpop.eup %1587 }
 0x45d   :  { %v769_v56 = vadd.f32 %v768_v59, %v767_v52 }
 0x45f   :  { %1589 = vtanh.f32 %v769_v56  ;;  %v2233_v48 = vsel %vm779_vm11, %v769_v56, %v2186_v40 }
 0x469   :  { %v1590_v60 = vpop.eup %1589 }
 0x46a   :  { %v771_v61 = vmul.f32 %v1590_v60, %v1588_v8 }
 0x46c   :  { %v2236_v63 = vsel %vm779_vm11, %v771_v61, %v2189_v36  ;;  %v782_v9 = vsel %vm779_vm11, %v771_v61, 0.0 }
 0x46d   :  { %784 = vst [vmem:[#allocation14 + $0x10] sm:$0xff] %v782_v9  ;;  %v790_v21 = vpack.c.bf16 %v2236_v63, %v2236_v63 }
 0x46f   :  { %824 = vmatmul.mubr.bf16.vlgmr.msra.gmra.mrb[28].mxu0 %v790_v21  ;;  %865 = vmatmul.mubr.bf16.vlgmr.msra.gmra.mrb[28].mxu1 %v790_v21 }
 0x470   :  { %921 = vmatpush1.bf16.msra.mxu0 %v1980_v26  ;;  %962 = vmatpush1.bf16.msra.mxu1 %v1992_v41 }
 0x471   :  { %922 = vmatprep.subr.bf16.mxu0 %v1982_v38  ;;  %963 = vmatprep.subr.bf16.mxu1 %v1994_v42 }
 0x472   :  { %952 = vmatprep.mubr.bf16.mxu0 %v2439_v2  ;;  %993 = vmatprep.mubr.bf16.mxu1 %v2439_v2 }
 0x474   :  { %923 = vmatpush1.bf16.msra.mxu0 %v1989_v28  ;;  %964 = vmatpush1.bf16.msra.mxu1 %v2000_v46 }
 0x475   :  { %924 = vmatprep.subr.bf16.mxu0 %v1996_v45  ;;  %965 = vmatprep.subr.bf16.mxu1 %v2003_v49 }
 0x478   :  { %925 = vmatpush1.bf16.msra.mxu0 %v2006_v50  ;;  %966 = vmatpush1.bf16.msra.mxu1 %v2012_v54 }
 0x479   :  { %926 = vmatprep.subr.bf16.mxu0 %v2008_v53  ;;  %967 = vmatprep.subr.bf16.mxu1 %v2015_v57 }
 0x47c   :  { %927 = vmatpush1.bf16.msra.mxu0 %v2018_v58  ;;  %968 = vmatpush1.bf16.msra.mxu1 %v2031_v1 }
 0x47d   :  { %928 = vmatprep.subr.bf16.mxu0 %v2025_v62  ;;  %969 = vmatprep.subr.bf16.mxu1 %v2035_v6 }
 0x480   :  { %929 = vmatpush1.bf16.msra.mxu0 %v2038_v7  ;;  %970 = vmatpush1.bf16.msra.mxu1 %v2046_v14 }
 0x481   :  { %930 = vmatprep.subr.bf16.mxu0 %v2041_v11  ;;  %971 = vmatprep.subr.bf16.mxu1 %v2049_v15 }
 0x484   :  { %931 = vmatpush1.bf16.msra.mxu0 %v2052_v18  ;;  %972 = vmatpush1.bf16.msra.mxu1 %v2060_v23 }
 0x485   :  { %932 = vmatprep.subr.bf16.mxu0 %v2055_v22  ;;  %973 = vmatprep.subr.bf16.mxu1 %v2063_v30 }
 0x488   :  { %933 = vmatpush1.bf16.msra.mxu0 %v2066_v33  ;;  %974 = vmatpush1.bf16.msra.mxu1 %v2073_v29 }
 0x489   :  { %934 = vmatprep.subr.bf16.mxu0 %v2069_v10  ;;  %975 = vmatprep.subr.bf16.mxu1 %v2078_v34 }
 0x48c   :  { %935 = vmatpush1.bf16.msra.mxu0 %v2081_v19  ;;  %976 = vmatpush1.bf16.msra.mxu1 %v2087_v24 }
 0x48d   :  { %1049 = vmatprep.subr.bf16.mxu0 %v1978_v25  ;;  %1090 = vmatprep.subr.bf16.mxu1 %v1986_v27 }
 0x542   :  { %v825_v40 = vpop.f32.mrb[28].mxu0  ;;  %v866_v36 = vpop.f32.mrb[28].mxu1 }
 0x543   :  { %v873_v37 = vadd.f32 %v825_v40, %v1924_v55  ;;  %v827_v39 = vpop.f32.mrb[29].mxu0  ;;  %v868_v31 = vpop.f32.mrb[29].mxu1  ;;  %v875_v0 = vadd.f32 %v866_v36, %v2442_v16 }
 0x544   :  { %v874_v3 = vadd.f32 %v827_v39, %v2440_v43  ;;  %v829_v35 = vpop.f32.mrb[30].mxu0  ;;  %v870_v12 = vpop.f32.mrb[30].mxu1  ;;  %v876_v51 = vadd.f32 %v868_v31, %v2441_v44  ;;  %v2444_v44 = vld [vmem:[#allocation26_spill] sm:$0xff] }
 0x545   :  { %v1497_v17 = vmul.f32 -1.442695, %v873_v37  ;;  %v830_v5 = vpop.f32.mrb[31].mxu0  ;;  %v871_v4 = vpop.f32.mrb[31].mxu1 }
 0x546   :  { %v1498_v47 = vmul.f32 -1.442695, %v874_v3  ;;  %v1499_v13 = vmul.f32 -1.442695, %v876_v51  ;;  %v907_v40 = vpop.permute.xlu1 %906 }
 0x547   :  { %1591 = vpow2.f32 %v1497_v17  ;;  %vm908_vm12 = vcmp.eq.s32.totalorder %v907_v40, 1  ;;  %v2443_v17 = vld [vmem:[#allocation24_spill] sm:$0xff] }
 0x548   :  { %1593 = vpow2.f32 %v1498_v47 }
 0x549   :  { %1595 = vpow2.f32 %v1499_v13 }
 0x54a   :  { %1597 = vtanh.f32 %v875_v0 }
 0x551   :  { %v1592_v20 = vpop.eup %1591 }
 0x552   :  { %v1594_v32 = vpop.eup %1593  ;;  %v880_v55 = vadd.f32 1.0, %v1592_v20 }
 0x553   :  { %v886_v59 = vadd.f32 1.0, %v1594_v32  ;;  %v1596_v52 = vpop.eup %1595 }
 0x554   :  { %1599 = vrcp.f32 %v880_v55  ;;  %v1598_v56 = vpop.eup %1597  ;;  %v893_v9 = vadd.f32 1.0, %v1596_v52 }
 0x555   :  { %1601 = vrcp.f32 %v886_v59  ;;  %v2445_v59 = vld [vmem:[#allocation27_spill] sm:$0xff] }
 0x556   :  { %1603 = vrcp.f32 %v893_v9 }
 0x55e   :  { %v1600_v8 = vpop.eup %1599 }
 0x55f   :  { %v1602_v60 = vpop.eup %1601  ;;  %v897_v61 = vmul.f32 %v1600_v8, %v1598_v56 }
 0x560   :  { %v896_v21 = vmul.f32 %v1602_v60, %v2233_v48  ;;  %v1604_v39 = vpop.eup %1603 }
 0x562   :  { %v898_v37 = vadd.f32 %v897_v61, %v896_v21 }
 0x564   :  { %1605 = vtanh.f32 %v898_v37  ;;  %v2280_v36 = vsel %vm908_vm12, %v898_v37, %v2233_v48 }
 0x56e   :  { %v1606_v31 = vpop.eup %1605 }
 0x56f   :  { %v900_v43 = vmul.f32 %v1606_v31, %v1604_v39 }
 0x571   :  { %v2283_v3 = vsel %vm908_vm12, %v900_v43, %v2236_v63  ;;  %v911_v35 = vsel %vm908_vm12, %v900_v43, 0.0 }
 0x572   :  { %913 = vst [vmem:[#allocation14 + $0x18] sm:$0xff] %v911_v35  ;;  %v919_v12 = vpack.c.bf16 %v2283_v3, %v2283_v3 }
 0x574   :  { %953 = vmatmul.mubr.bf16.vlgmr.msra.gmra.mrb[32].mxu0 %v919_v12  ;;  %994 = vmatmul.mubr.bf16.vlgmr.msra.gmra.mrb[32].mxu1 %v919_v12  ;;  %v1036_v12 = vpop.permute.xlu0 %1035 }
 0x575   :  { %1050 = vmatpush1.bf16.msra.mxu0 %v1980_v26  ;;  %1091 = vmatpush1.bf16.msra.mxu1 %v1992_v41  ;;  %vm1037_vm13 = vcmp.eq.s32.totalorder %v1036_v12, 1  ;;  %v1686_v12 = vld [vmem:[#allocation5 + $0x70] sm:$0xff] }
 0x576   :  { %1051 = vmatprep.subr.bf16.mxu0 %v1982_v38  ;;  %1092 = vmatprep.subr.bf16.mxu1 %v1994_v42 }
 0x577   :  { %1081 = vmatprep.mubr.bf16.mxu0 %v2439_v2  ;;  %1122 = vmatprep.mubr.bf16.mxu1 %v2439_v2 }
 0x579   :  { %1052 = vmatpush1.bf16.msra.mxu0 %v1989_v28  ;;  %1093 = vmatpush1.bf16.msra.mxu1 %v2000_v46 }
 0x57a   :  { %1053 = vmatprep.subr.bf16.mxu0 %v1996_v45  ;;  %1094 = vmatprep.subr.bf16.mxu1 %v2003_v49 }
 0x57d   :  { %1054 = vmatpush1.bf16.msra.mxu0 %v2006_v50  ;;  %1095 = vmatpush1.bf16.msra.mxu1 %v2012_v54 }
 0x57e   :  { %1055 = vmatprep.subr.bf16.mxu0 %v2008_v53  ;;  %1096 = vmatprep.subr.bf16.mxu1 %v2015_v57 }
 0x581   :  { %1056 = vmatpush1.bf16.msra.mxu0 %v2018_v58  ;;  %1097 = vmatpush1.bf16.msra.mxu1 %v2031_v1 }
 0x582   :  { %1057 = vmatprep.subr.bf16.mxu0 %v2025_v62  ;;  %1098 = vmatprep.subr.bf16.mxu1 %v2035_v6 }
 0x585   :  { %1058 = vmatpush1.bf16.msra.mxu0 %v2038_v7  ;;  %1099 = vmatpush1.bf16.msra.mxu1 %v2046_v14 }
 0x586   :  { %1059 = vmatprep.subr.bf16.mxu0 %v2041_v11  ;;  %1100 = vmatprep.subr.bf16.mxu1 %v2049_v15 }
 0x589   :  { %1060 = vmatpush1.bf16.msra.mxu0 %v2052_v18  ;;  %1101 = vmatpush1.bf16.msra.mxu1 %v2060_v23 }
 0x58a   :  { %1061 = vmatprep.subr.bf16.mxu0 %v2055_v22  ;;  %1102 = vmatprep.subr.bf16.mxu1 %v2063_v30 }
 0x58d   :  { %1062 = vmatpush1.bf16.msra.mxu0 %v2066_v33  ;;  %1103 = vmatpush1.bf16.msra.mxu1 %v2073_v29 }
 0x58e   :  { %1063 = vmatprep.subr.bf16.mxu0 %v2069_v10  ;;  %1104 = vmatprep.subr.bf16.mxu1 %v2078_v34 }
 0x591   :  { %1064 = vmatpush1.bf16.msra.mxu0 %v2081_v19  ;;  %1105 = vmatpush1.bf16.msra.mxu1 %v2087_v24 }
 0x592   :  { %1178 = vmatprep.subr.bf16.mxu0 %v1978_v25  ;;  %1219 = vmatprep.subr.bf16.mxu1 %v1986_v27  ;;  %v2446_v27 = vld [vmem:[#allocation25_spill] sm:$0xff] }
 0x647   :  { %v954_v48 = vpop.f32.mrb[32].mxu0  ;;  %v995_v63 = vpop.f32.mrb[32].mxu1 }
 0x648   :  { %v1002_v5 = vadd.f32 %v954_v48, %v2443_v17  ;;  %v956_v4 = vpop.f32.mrb[33].mxu0  ;;  %v997_v47 = vpop.f32.mrb[33].mxu1  ;;  %v1004_v56 = vadd.f32 %v995_v63, %v2446_v27  ;;  %v1673_v27 = vld [vmem:[#allocation5] sm:$0xff] }
 0x649   :  { %v1003_v51 = vadd.f32 %v956_v4, %v2444_v44  ;;  %v958_v13 = vpop.f32.mrb[34].mxu0  ;;  %v999_v16 = vpop.f32.mrb[34].mxu1  ;;  %v1005_v25 = vadd.f32 %v997_v47, %v2445_v59 }
 0x64a   :  { %v1500_v0 = vmul.f32 -1.442695, %v1002_v5  ;;  %v959_v20 = vpop.f32.mrb[35].mxu0  ;;  %v1000_v32 = vpop.f32.mrb[35].mxu1 }
 0x64b   :  { %v1501_v55 = vmul.f32 -1.442695, %v1003_v51  ;;  %v1502_v52 = vmul.f32 -1.442695, %v1005_v25  ;;  %v1165_v13 = vpop.permute.xlu1 %1164 }
 0x64c   :  { %1607 = vpow2.f32 %v1500_v0  ;;  %vm1166_vm14 = vcmp.eq.s32.totalorder %v1165_v13, 1 }
 0x64d   :  { %1609 = vpow2.f32 %v1501_v55 }
 0x64e   :  { %1611 = vpow2.f32 %v1502_v52 }
 0x64f   :  { %1613 = vtanh.f32 %v1004_v56  ;;  %v1674_v56 = vld [vmem:[#allocation5 + $0x10] sm:$0xff] }
 0x656   :  { %v1608_v8 = vpop.eup %1607 }
 0x657   :  { %v1610_v60 = vpop.eup %1609  ;;  %v1009_v61 = vadd.f32 1.0, %v1608_v8  ;;  %v1675_v8 = vld [vmem:[#allocation5 + $0x28] sm:$0xff] }
 0x658   :  { %v1015_v9 = vadd.f32 1.0, %v1610_v60  ;;  %v1612_v21 = vpop.eup %1611  ;;  %v1676_v60 = vld [vmem:[#allocation5 + $0x38] sm:$0xff] }
 0x659   :  { %1615 = vrcp.f32 %v1009_v61  ;;  %v1614_v40 = vpop.eup %1613  ;;  %v1022_v43 = vadd.f32 1.0, %v1612_v21  ;;  %v1677_v61 = vld [vmem:[#allocation5 + $0x20] sm:$0xff]  ;;  %v1679_v21 = vld [vmem:[#allocation5 + $0x48] sm:$0xff] }
 0x65a   :  { %1617 = vrcp.f32 %v1015_v9  ;;  %v1678_v9 = vld [vmem:[#allocation5 + $0x30] sm:$0xff] }
 0x65b   :  { %1619 = vrcp.f32 %v1022_v43  ;;  %v1684_v43 = vld [vmem:[#allocation5 + $0x78] sm:$0xff] }
 0x663   :  { %v1616_v37 = vpop.eup %1615 }
 0x664   :  { %v1618_v39 = vpop.eup %1617  ;;  %v1026_v31 = vmul.f32 %v1616_v37, %v1614_v40  ;;  %v1680_v40 = vld [vmem:[#allocation5 + $0x58] sm:$0xff]  ;;  %v1681_v37 = vld [vmem:[#allocation5 + $0x40] sm:$0xff] }
 0x665   :  { %v1025_v35 = vmul.f32 %v1618_v39, %v2280_v36  ;;  %v1620_v17 = vpop.eup %1619  ;;  %v1682_v39 = vld [vmem:[#allocation5 + $0x50] sm:$0xff] }
 0x667   :  { %v1027_v48 = vadd.f32 %v1026_v31, %v1025_v35  ;;  %v1683_v31 = vld [vmem:[#allocation5 + $0x68] sm:$0xff]  ;;  %v1685_v35 = vld [vmem:[#allocation5 + $0x60] sm:$0xff] }
 0x669   :  { %1621 = vtanh.f32 %v1027_v48  ;;  %v2327_v63 = vsel %vm1037_vm13, %v1027_v48, %v2280_v36  ;;  %v1688_v48 = vld [vmem:[#allocation5 + $0x98] sm:$0xff] }
 0x673   :  { %v1622_v5 = vpop.eup %1621 }
 0x674   :  { %v1029_v4 = vmul.f32 %v1622_v5, %v1620_v17  ;;  %v1690_v17 = vld [vmem:[#allocation5 + $0x90] sm:$0xff]  ;;  %v1691_v5 = vld [vmem:[#allocation5 + $0xa8] sm:$0xff] }
 0x676   :  { %v2330_v47 = vsel %vm1037_vm13, %v1029_v4, %v2283_v3  ;;  %v1040_v44 = vsel %vm1037_vm13, %v1029_v4, 0.0  ;;  %v1692_v4 = vld [vmem:[#allocation5 + $0xb8] sm:$0xff] }
 0x677   :  { %1042 = vst [vmem:[#allocation14 + $0x20] sm:$0xff] %v1040_v44  ;;  %v1048_v51 = vpack.c.bf16 %v2330_v47, %v2330_v47  ;;  %v1694_v44 = vld [vmem:[#allocation5 + $0xb0] sm:$0xff] }
 0x679   :  { %1082 = vmatmul.mubr.bf16.vlgmr.msra.gmra.mrb[36].mxu0 %v1048_v51  ;;  %1123 = vmatmul.mubr.bf16.vlgmr.msra.gmra.mrb[36].mxu1 %v1048_v51  ;;  %v1695_v51 = vld [vmem:[#allocation5 + $0xc8] sm:$0xff] }
 0x67a   :  { %1179 = vmatpush1.bf16.msra.mxu0 %v1980_v26  ;;  %1220 = vmatpush1.bf16.msra.mxu1 %v1992_v41  ;;  %v1671_v26 = vld [vmem:[#allocation5 + $0x8] sm:$0xff] }
 0x67b   :  { %1180 = vmatprep.subr.bf16.mxu0 %v1982_v38  ;;  %1221 = vmatprep.subr.bf16.mxu1 %v1994_v42  ;;  %v1672_v38 = vld [vmem:[#allocation5 + $0x18] sm:$0xff] }
 0x67c   :  { %1210 = vmatprep.mubr.bf16.mxu0 %v2439_v2  ;;  %1251 = vmatprep.mubr.bf16.mxu1 %v2439_v2  ;;  %v2447_v42 = vld [vmem:[#allocation28_spill] sm:$0xff] }
 0x67e   :  { %1181 = vmatpush1.bf16.msra.mxu0 %v1989_v28  ;;  %1222 = vmatpush1.bf16.msra.mxu1 %v2000_v46 }
 0x67f   :  { %1182 = vmatprep.subr.bf16.mxu0 %v1996_v45  ;;  %1223 = vmatprep.subr.bf16.mxu1 %v2003_v49 }
 0x682   :  { %1183 = vmatpush1.bf16.msra.mxu0 %v2006_v50  ;;  %1224 = vmatpush1.bf16.msra.mxu1 %v2012_v54  ;;  %v2448_v50 = vld [vmem:[#allocation30_spill] sm:$0xff] }
 0x683   :  { %1184 = vmatprep.subr.bf16.mxu0 %v2008_v53  ;;  %1225 = vmatprep.subr.bf16.mxu1 %v2015_v57 }
 0x686   :  { %1185 = vmatpush1.bf16.msra.mxu0 %v2018_v58  ;;  %1226 = vmatpush1.bf16.msra.mxu1 %v2031_v1 }
 0x687   :  { %1186 = vmatprep.subr.bf16.mxu0 %v2025_v62  ;;  %1227 = vmatprep.subr.bf16.mxu1 %v2035_v6 }
 0x68a   :  { %1187 = vmatpush1.bf16.msra.mxu0 %v2038_v7  ;;  %1228 = vmatpush1.bf16.msra.mxu1 %v2046_v14  ;;  %v2450_v7 = vld [vmem:[#allocation29_spill] sm:$0xff] }
 0x68b   :  { %1188 = vmatprep.subr.bf16.mxu0 %v2041_v11  ;;  %1229 = vmatprep.subr.bf16.mxu1 %v2049_v15 }
 0x68e   :  { %1189 = vmatpush1.bf16.msra.mxu0 %v2052_v18  ;;  %1230 = vmatpush1.bf16.msra.mxu1 %v2060_v23 }
 0x68f   :  { %1190 = vmatprep.subr.bf16.mxu0 %v2055_v22  ;;  %1231 = vmatprep.subr.bf16.mxu1 %v2063_v30 }
 0x692   :  { %1191 = vmatpush1.bf16.msra.mxu0 %v2066_v33  ;;  %1232 = vmatpush1.bf16.msra.mxu1 %v2073_v29 }
 0x693   :  { %1192 = vmatprep.subr.bf16.mxu0 %v2069_v10  ;;  %1233 = vmatprep.subr.bf16.mxu1 %v2078_v34 }
 0x696   :  { %1193 = vmatpush1.bf16.msra.mxu0 %v2081_v19  ;;  %1234 = vmatpush1.bf16.msra.mxu1 %v2087_v24  ;;  %v2449_v24 = vld [vmem:[#allocation31_spill] sm:$0xff] }
 0x697   :  { %1307 = vmatprep.subr.bf16.mxu0 %v1671_v26  ;;  %1348 = vmatprep.subr.bf16.mxu1 %v1672_v38  ;;  %v1696_v26 = vld [vmem:[#allocation5 + $0xd8] sm:$0xff]  ;;  %v1697_v38 = vld [vmem:[#allocation5 + $0xc0] sm:$0xff] }
 0x74c   :  { %v1083_v28 = vpop.f32.mrb[36].mxu0  ;;  %v1124_v41 = vpop.f32.mrb[36].mxu1 }
 0x74d   :  { %v1131_v45 = vadd.f32 %v1083_v28, %v2447_v42  ;;  %v1085_v46 = vpop.f32.mrb[37].mxu0  ;;  %v1126_v49 = vpop.f32.mrb[37].mxu1  ;;  %v1133_v11 = vadd.f32 %v1124_v41, %v2450_v7  ;;  %v1698_v28 = vld [vmem:[#allocation5 + $0xd0] sm:$0xff]  ;;  %v1699_v41 = vld [vmem:[#allocation5 + $0xe8] sm:$0xff]  ;;  %v1700_v42 = vld [vmem:[#allocation5 + $0xf8] sm:$0xff] }
 0x74e   :  { %v1132_v29 = vadd.f32 %v1085_v46, %v2448_v50  ;;  %v1087_v53 = vpop.f32.mrb[38].mxu0  ;;  %v1128_v54 = vpop.f32.mrb[38].mxu1  ;;  %v1134_v1 = vadd.f32 %v1126_v49, %v2449_v24  ;;  %v1702_v46 = vld [vmem:[#allocation5 + $0xf0] sm:$0xff] }
 0x74f   :  { %v1503_v57 = vmul.f32 -1.442695, %v1131_v45  ;;  %v1088_v34 = vpop.f32.mrb[39].mxu0  ;;  %v1129_v58 = vpop.f32.mrb[39].mxu1  ;;  %v1701_v45 = vld [vmem:[#allocation5 + $0xe0] sm:$0xff] }
 0x750   :  { %v1504_v62 = vmul.f32 -1.442695, %v1132_v29  ;;  %v1505_v6 = vmul.f32 -1.442695, %v1134_v1  ;;  %v2451_v29 = vld [vmem:[#allocation32_spill] sm:$0xff]  ;;  %v2452_v34 = vld [vmem:[#allocation34_spill] sm:$0xff] }
 0x751   :  { %1623 = vpow2.f32 %v1503_v57 }
 0x752   :  { %1625 = vpow2.f32 %v1504_v62 }
 0x753   :  { %1627 = vpow2.f32 %v1505_v6 }
 0x754   :  { %1629 = vtanh.f32 %v1133_v11 }
 0x75b   :  { %v1624_v14 = vpop.eup %1623 }
 0x75c   :  { %v1626_v15 = vpop.eup %1625  ;;  %v1138_v18 = vadd.f32 1.0, %v1624_v14  ;;  %v2453_v14 = vld [vmem:[#allocation35_spill] sm:$0xff] }
 0x75d   :  { %v1144_v22 = vadd.f32 1.0, %v1626_v15  ;;  %v1628_v23 = vpop.eup %1627 }
 0x75e   :  { %1631 = vrcp.f32 %v1138_v18  ;;  %v1630_v30 = vpop.eup %1629  ;;  %v1151_v36 = vadd.f32 1.0, %v1628_v23 }
 0x75f   :  { %1633 = vrcp.f32 %v1144_v22  ;;  %v2454_v22 = vld [vmem:[#allocation33_spill] sm:$0xff] }
 0x760   :  { %1635 = vrcp.f32 %v1151_v36 }
 0x768   :  { %v1632_v33 = vpop.eup %1631 }
 0x769   :  { %v1634_v10 = vpop.eup %1633  ;;  %v1155_v19 = vmul.f32 %v1632_v33, %v1630_v30 }
 0x76a   :  { %v1154_v3 = vmul.f32 %v1634_v10, %v2327_v63  ;;  %v1636_v20 = vpop.eup %1635 }
 0x76c   :  { %v1156_v16 = vadd.f32 %v1155_v19, %v1154_v3 }
 0x76e   :  { %1637 = vtanh.f32 %v1156_v16  ;;  %v2372_v0 = vsel %vm1166_vm14, %v1156_v16, %v2327_v63  ;;  %v1689_v63 = vld [vmem:[#allocation5 + $0x80] sm:$0xff] }
 0x778   :  { %v1638_v32 = vpop.eup %1637 }
 0x779   :  { %v1158_v55 = vmul.f32 %v1638_v32, %v1636_v20 }
 0x77b   :  { %v2375_v59 = vsel %vm1166_vm14, %v1158_v55, %v2330_v47  ;;  %v1169_v25 = vsel %vm1166_vm14, %v1158_v55, 0.0  ;;  %v1693_v47 = vld [vmem:[#allocation5 + $0xa0] sm:$0xff]  ;;  %v1294_v55 = vpop.permute.xlu0 %1293 }
 0x77c   :  { %1171 = vst [vmem:[#allocation14 + $0x28] sm:$0xff] %v1169_v25  ;;  %v1177_v52 = vpack.c.bf16 %v2375_v59, %v2375_v59  ;;  %vm1295_vm15 = vcmp.eq.s32.totalorder %v1294_v55, 1 }
 0x77e   :  { %1211 = vmatmul.mubr.bf16.vlgmr.msra.gmra.mrb[40].mxu0 %v1177_v52  ;;  %1252 = vmatmul.mubr.bf16.vlgmr.msra.gmra.mrb[40].mxu1 %v1177_v52 }
 0x77f   :  { %1308 = vmatpush1.bf16.msra.mxu0 %v1673_v27  ;;  %1349 = vmatpush1.bf16.msra.mxu1 %v1674_v56 }
 0x780   :  { %1309 = vmatprep.subr.bf16.mxu0 %v1675_v8  ;;  %1350 = vmatprep.subr.bf16.mxu1 %v1676_v60 }
 0x781   :  { %1339 = vmatprep.mubr.bf16.mxu0 %v2439_v2  ;;  %1380 = vmatprep.mubr.bf16.mxu1 %v2439_v2  ;;  %v1687_v2 = vld [vmem:[#allocation5 + $0x88] sm:$0xff] }
 0x783   :  { %1310 = vmatpush1.bf16.msra.mxu0 %v1677_v61  ;;  %1351 = vmatpush1.bf16.msra.mxu1 %v1678_v9 }
 0x784   :  { %1311 = vmatprep.subr.bf16.mxu0 %v1679_v21  ;;  %1352 = vmatprep.subr.bf16.mxu1 %v1680_v40 }
 0x787   :  { %1312 = vmatpush1.bf16.msra.mxu0 %v1681_v37  ;;  %1353 = vmatpush1.bf16.msra.mxu1 %v1682_v39  ;;  %v2455_v39 = vld [vmem:[#allocation36_spill] sm:$0xff] }
 0x788   :  { %1313 = vmatprep.subr.bf16.mxu0 %v1683_v31  ;;  %1354 = vmatprep.subr.bf16.mxu1 %v1684_v43 }
 0x78b   :  { %1314 = vmatpush1.bf16.msra.mxu0 %v1685_v35  ;;  %1355 = vmatpush1.bf16.msra.mxu1 %v1686_v12  ;;  %v2456_v12 = vld [vmem:[#allocation38_spill] sm:$0xff] }
 0x78c   :  { %1315 = vmatprep.subr.bf16.mxu0 %v1687_v2  ;;  %1356 = vmatprep.subr.bf16.mxu1 %v1688_v48 }
 0x78f   :  { %1316 = vmatpush1.bf16.msra.mxu0 %v1689_v63  ;;  %1357 = vmatpush1.bf16.msra.mxu1 %v1690_v17 }
 0x790   :  { %1317 = vmatprep.subr.bf16.mxu0 %v1691_v5  ;;  %1358 = vmatprep.subr.bf16.mxu1 %v1692_v4 }
 0x793   :  { %1318 = vmatpush1.bf16.msra.mxu0 %v1693_v47  ;;  %1359 = vmatpush1.bf16.msra.mxu1 %v1694_v44 }
 0x794   :  { %1319 = vmatprep.subr.bf16.mxu0 %v1695_v51  ;;  %1360 = vmatprep.subr.bf16.mxu1 %v1696_v26  ;;  %v2458_v51 = vld [vmem:[#allocation37_spill] sm:$0xff] }
 0x797   :  { %1320 = vmatpush1.bf16.msra.mxu0 %v1697_v38  ;;  %1361 = vmatpush1.bf16.msra.mxu1 %v1698_v28 }
 0x798   :  { %1321 = vmatprep.subr.bf16.mxu0 %v1699_v41  ;;  %1362 = vmatprep.subr.bf16.mxu1 %v1700_v42 }
 0x79b   :  { %1322 = vmatpush1.bf16.msra.mxu0 %v1701_v45  ;;  %1363 = vmatpush1.bf16.msra.mxu1 %v1702_v46 }
 0x851   :  { %v1212_v49 = vpop.f32.mrb[40].mxu0  ;;  %v1253_v50 = vpop.f32.mrb[40].mxu1 }
 0x852   :  { %v1260_v53 = vadd.f32 %v1212_v49, %v2451_v29  ;;  %v1214_v54 = vpop.f32.mrb[41].mxu0  ;;  %v1255_v57 = vpop.f32.mrb[41].mxu1  ;;  %v1262_v23 = vadd.f32 %v1253_v50, %v2454_v22 }
 0x853   :  { %v1261_v58 = vadd.f32 %v1214_v54, %v2452_v34  ;;  %v1216_v62 = vpop.f32.mrb[42].mxu0  ;;  %v1257_v24 = vpop.f32.mrb[42].mxu1  ;;  %v1263_v15 = vadd.f32 %v1255_v57, %v2453_v14 }
 0x854   :  { %v1506_v1 = vmul.f32 -1.442695, %v1260_v53  ;;  %v1217_v6 = vpop.f32.mrb[43].mxu0  ;;  %v1258_v7 = vpop.f32.mrb[43].mxu1 }
 0x855   :  { %v1507_v11 = vmul.f32 -1.442695, %v1261_v58  ;;  %v1508_v18 = vmul.f32 -1.442695, %v1263_v15  ;;  %v1423_v54 = vpop.permute.xlu1 %1422 }
 0x856   :  { %1639 = vpow2.f32 %v1506_v1  ;;  %vm1424_vm0 = vcmp.eq.s32.totalorder %v1423_v54, 1 }
 0x857   :  { %1641 = vpow2.f32 %v1507_v11 }
 0x858   :  { %1643 = vpow2.f32 %v1508_v18 }
 0x859   :  { %1645 = vtanh.f32 %v1262_v23 }
 0x860   :  { %v1640_v30 = vpop.eup %1639 }
 0x861   :  { %v1642_v33 = vpop.eup %1641  ;;  %v1267_v10 = vadd.f32 1.0, %v1640_v30 }
 0x862   :  { %v1273_v19 = vadd.f32 1.0, %v1642_v33  ;;  %v1644_v36 = vpop.eup %1643 }
 0x863   :  { %1647 = vrcp.f32 %v1267_v10  ;;  %v1646_v3 = vpop.eup %1645  ;;  %v1280_v32 = vadd.f32 1.0, %v1644_v36 }
 0x864   :  { %1649 = vrcp.f32 %v1273_v19 }
 0x865   :  { %1651 = vrcp.f32 %v1280_v32 }
 0x86d   :  { %v1648_v13 = vpop.eup %1647 }
 0x86e   :  { %v1650_v16 = vpop.eup %1649  ;;  %v1284_v20 = vmul.f32 %v1648_v13, %v1646_v3 }
 0x86f   :  { %v1283_v25 = vmul.f32 %v1650_v16, %v2372_v0  ;;  %v1652_v56 = vpop.eup %1651 }
 0x871   :  { %v1285_v52 = vadd.f32 %v1284_v20, %v1283_v25 }
 0x873   :  { %1653 = vtanh.f32 %v1285_v52  ;;  %v1296_v27 = vsel %vm1295_vm15, %v1285_v52, %v2372_v0 }
 0x87d   :  { %v1654_v8 = vpop.eup %1653 }
 0x87e   :  { %v1287_v60 = vmul.f32 %v1654_v8, %v1652_v56 }
 0x880   :  { %v1297_v61 = vsel %vm1295_vm15, %v1287_v60, %v2375_v59  ;;  %v1298_v9 = vsel %vm1295_vm15, %v1287_v60, 0.0  ;;  %v2457_v59 = vld [vmem:[#allocation39_spill] sm:$0xff] }
 0x881   :  { %1300 = vst [vmem:[#allocation14 + $0x30] sm:$0xff] %v1298_v9  ;;  %v1306_v21 = vpack.c.bf16 %v1297_v61, %v1297_v61 }
 0x883   :  { %1340 = vmatmul.mubr.bf16.vlgmr.msra.gmra.mrb[44].mxu0 %v1306_v21  ;;  %1381 = vmatmul.mubr.bf16.vlgmr.msra.gmra.mrb[44].mxu1 %v1306_v21 }
 0x956   :  { %v1341_v40 = vpop.f32.mrb[44].mxu0  ;;  %v1382_v37 = vpop.f32.mrb[44].mxu1 }
 0x957   :  { %v1389_v31 = vadd.f32 %v1341_v40, %v2455_v39  ;;  %v1343_v43 = vpop.f32.mrb[45].mxu0  ;;  %v1384_v35 = vpop.f32.mrb[45].mxu1  ;;  %v1391_v26 = vadd.f32 %v1382_v37, %v2458_v51 }
 0x958   :  { %v1390_v2 = vadd.f32 %v1343_v43, %v2456_v12  ;;  %v1345_v48 = vpop.f32.mrb[46].mxu0  ;;  %v1386_v0 = vpop.f32.mrb[46].mxu1  ;;  %v1392_v47 = vadd.f32 %v1384_v35, %v2457_v59 }
 0x959   :  { %v1509_v63 = vmul.f32 -1.442695, %v1389_v31  ;;  %v1346_v17 = vpop.f32.mrb[47].mxu0  ;;  %v1387_v5 = vpop.f32.mrb[47].mxu1 }
 0x95a   :  { %v1510_v4 = vmul.f32 -1.442695, %v1390_v2  ;;  %v1511_v44 = vmul.f32 -1.442695, %v1392_v47 }
 0x95b   :  { %1655 = vpow2.f32 %v1509_v63 }
 0x95c   :  { %1657 = vpow2.f32 %v1510_v4 }
 0x95d   :  { %1659 = vpow2.f32 %v1511_v44 }
 0x95e   :  { %1661 = vtanh.f32 %v1391_v26 }
 0x965   :  { %v1656_v38 = vpop.eup %1655 }
 0x966   :  { %v1658_v28 = vpop.eup %1657  ;;  %v1396_v41 = vadd.f32 1.0, %v1656_v38 }
 0x967   :  { %v1402_v42 = vadd.f32 1.0, %v1658_v28  ;;  %v1660_v45 = vpop.eup %1659 }
 0x968   :  { %1663 = vrcp.f32 %v1396_v41  ;;  %v1662_v46 = vpop.eup %1661  ;;  %v1409_v53 = vadd.f32 1.0, %v1660_v45 }
 0x969   :  { %1665 = vrcp.f32 %v1402_v42 }
 0x96a   :  { %1667 = vrcp.f32 %v1409_v53 }
 0x972   :  { %v1664_v49 = vpop.eup %1663 }
 0x973   :  { %v1666_v50 = vpop.eup %1665  ;;  %v1413_v29 = vmul.f32 %v1664_v49, %v1662_v46 }
 0x974   :  { %v1412_v57 = vmul.f32 %v1666_v50, %v1296_v27  ;;  %v1668_v62 = vpop.eup %1667 }
 0x976   :  { %v1414_v34 = vadd.f32 %v1413_v29, %v1412_v57 }
 0x978   :  { %1669 = vtanh.f32 %v1414_v34  ;;  %v1425_v58 = vsel %vm1424_vm0, %v1414_v34, %v1296_v27 }
 0x979   :  { %1431 = vst [vmem:[#allocation3] sm:$0xff] %v1425_v58 }
 0x982   :  { %v1670_v24 = vpop.eup %1669 }
 0x983   :  { %v1416_v1 = vmul.f32 %v1670_v24, %v1668_v62 }
 0x985   :  { %v1426_v6 = vsel %vm1424_vm0, %v1416_v1, %v1297_v61  ;;  %v1427_v7 = vsel %vm1424_vm0, %v1416_v1, 0.0 }
 0x986   :  { %1429 = vst [vmem:[#allocation14 + $0x38] sm:$0xff] %v1427_v7  ;;  %1430 = vst [vmem:[#allocation2] sm:$0xff] %v1426_v6 }
 0x987 PF:  { %1435 = sbr.rel (%p1471_p2) target bundleno = 2446 (0x98e), region = 41  ;;  %v1794_v11 = vmov (!%p1471_p2), 0.0  }
 0x988   :  { %1436 = vst [vmem:[#allocation14] sm:$0xff] (!%p1471_p2), %v1794_v11  ;;  %1437 = vst [vmem:[#allocation14 + $0x8] sm:$0xff] (!%p1471_p2), %v1794_v11 }
 0x989   :  { %1438 = vst [vmem:[#allocation14 + $0x10] sm:$0xff] (!%p1471_p2), %v1794_v11  ;;  %1439 = vst [vmem:[#allocation14 + $0x18] sm:$0xff] (!%p1471_p2), %v1794_v11 }
 0x98a   :  { %1440 = vst [vmem:[#allocation14 + $0x20] sm:$0xff] (!%p1471_p2), %v1794_v11  ;;  %1441 = vst [vmem:[#allocation14 + $0x28] sm:$0xff] (!%p1471_p2), %v1794_v11 }
 0x98b   :  { %1442 = vst [vmem:[#allocation14 + $0x30] sm:$0xff] (!%p1471_p2), %v1794_v11  ;;  %1443 = vst [vmem:[#allocation14 + $0x38] sm:$0xff] (!%p1471_p2), %v1794_v11 }
 0x98e PF:  { %s1795_s24 = smov [#allocation14]  }
 0x98f   :  { %s1449_s25 = sshll.u32 %s1795_s24, 4  ;;  %s1450_s25 = int_to_ptr.vmem [resolvable:$true] %s1449_s25 }
 0x990   :  { %s1747_s26 = scalar_lea.vmem %s1450_s25, 1024  ;;  %p1752_p5 = scmp.lt.s32.totalorder %s1450_s25, %s1450_s25 }
 0x991   :  { %p1748_p4 = scmp.ne.s32.totalorder %s1450_s25, %s1747_s26  ;;  %p1753_p6 = scmp.lt.s32.totalorder %s1747_s26, %s1747_s26 }
 0x993   :  { %p1754_p7 = por %p1753_p6, %p1752_p5 }
 0x995   :  { %p1755_p8 = pnand %p1754_p7, %p1748_p4 }
 0x997   :  { %1758 = shalt.err (!%p1755_p8)
}
 0x998   :  { %s1759_s28 = scalar_lea.hbm %s2417_s6, 1024 }
 0x999   :  { %p1760_p9 = scmp.ne.s32.totalorder %s2417_s6, %s1759_s28  ;;  %p1763_p10 = scmp.lt.u32.totalorder %s1759_s28, %s2417_s6 }
 0x99b   :  { %p1765_p11 = pnand %p1763_p10, %p1760_p9 }
 0x99d   :  { %1768 = shalt.err (!%p1765_p11)
}
 0x99e   :  { %1455 = dma.vmem_to_hbm [thread:$0]  %s1450_s25, 1024, %s2417_s6, [#allocation11], %s1778_s7, %s1778_s7, %s1779_s8  }
 0x99f   :  { %1775 = dma.done.wait [#allocation11], 1024  }
 0x9a0   :  { %1776 = vsyncadd [#allocation11], 4294966272 }
 0x9a1   :  { %1459 = vsyncpa [#allocation10], 1 }
 0x9a2   :  { %1460 = vsyncpa [#allocation13], 1 }
 0x9a3   :  { %1461 = vsyncpa [#allocation11], 1 }
 0x9a4   :  { %1462 = vsyncmov [#allocation6] }
 0x9a7   :  { %s1463_s12 = vpop.sfrf %1462 }
 0x9a8   :  { %p1514_p12 = scmp.ne.s32.totalorder %s1463_s12, 0 }
 0x9aa   :  { %1467 = shalt.err (%p1514_p12)  }

</bundles_post_ra>
